<compile_context>
chip_gen: v6e
topology: v6e:2x2x1
jax: 0.10.0
libtpu: 0.0.40
codegen_flags: <defaults>
</compile_context>

<pallas_src>
import functools
import math

import jax
import jax.numpy as jnp
from jax import lax
from jax.experimental import pallas as pl
from jax.experimental.pallas import tpu as pltpu


def _round_up(x, m):
    return (x + m - 1) // m * m


def _gru_recurrence_kernel(gx_ref, whh_ref, bhn_ref, out_ref, h_ref, *,
                           hp, time_chunk):
    """Recurrent part of the GRU. One grid step == `time_chunk` timesteps.

    gx_ref  : (TC, BT, 3*Hp) precomputed input projections (+ fused r/z biases)
    whh_ref : (Hp, 3*Hp)     hidden->hidden weights, gate blocks (r | z | n)
    bhn_ref : (1, Hp)        hidden bias of the candidate gate (stays inside r*(...))
    out_ref : (TC, BT, Hp)   outputs for this time chunk
    h_ref   : (BT, Hp)       VMEM scratch carrying the hidden state across chunks
    """
    # Re-initialize the hidden state at the first time chunk of every batch tile.
    @pl.when(pl.program_id(1) == 0)
    def _():
        h_ref[...] = jnp.zeros_like(h_ref)

    # Hoist resident-weight loads out of the time loop.
    whh = whh_ref[...]
    bhn = bhn_ref[...]
    # NOTE(perf, v6e/v7x): casting `whh` / `h_prev` to bfloat16 (keeping
    # preferred_element_type=f32) would hit the 256x256 bf16 MXU; kept f32 for
    # exact parity with the f32 PyTorch reference.

    def step(t, carry):
        h_prev = h_ref[...]
        # Single fused (BT, Hp) @ (Hp, 3*Hp) MXU push per timestep.
        gh = jnp.dot(h_prev, whh, preferred_element_type=jnp.float32)
        gx = gx_ref[t]                                   # (BT, 3*Hp)
        r = jax.nn.sigmoid(gx[:, 0:hp] + gh[:, 0:hp])
        z = jax.nn.sigmoid(gx[:, hp:2 * hp] + gh[:, hp:2 * hp])
        n = jnp.tanh(gx[:, 2 * hp:3 * hp] + r * (gh[:, 2 * hp:3 * hp] + bhn))
        h_new = (1.0 - z) * n + z * h_prev
        h_ref[...] = h_new
        out_ref[t] = h_new.astype(out_ref.dtype)
        return carry

    lax.fori_loop(0, time_chunk, step, 0, unroll=True)


@jax.jit
def controller_forward(x, w_ih, w_hh, b_ih, b_hh):
    """GRU forward matching torch.nn.GRU (single layer, h0 = 0).

    x    : (T, B, I) float32
    w_ih : (3H, I)   PyTorch layout, rows [W_ir; W_iz; W_in]
    w_hh : (3H, H)   rows [W_hr; W_hz; W_hn]
    b_ih : (3H,)
    b_hh : (3H,)
    returns (T, B, H) float32
    """
    T, B, I = x.shape
    H = w_hh.shape[1]
    f32 = jnp.float32

    hp = _round_up(H, 128)             # lane-dense hidden size (per gate block)

    # ---- Tile-size selection under a VMEM budget (fits v7x's 64 MiB / core).
    def vmem_est(bt, tc):
        return (2 * (tc * bt * 3 * hp + tc * bt * hp) * 4      # gx in + out (dbl-buf)
                + 2 * (hp * 3 * hp + 8 * hp) * 4               # whh + bhn (dbl-buf)
                + bt * hp * 4)                                  # h scratch

    bt = min(_round_up(B, 8), 128)     # batch tile: large => shorter serial chain
    tc = min(T, 32)                    # timesteps handled per grid step
    budget = 48 * 1024 * 1024
    while vmem_est(bt, tc) > budget and tc > 1:
        tc = max(1, tc // 2)
    while vmem_est(bt, tc) > budget and bt > 8:
        bt = max(8, bt // 2)
    bp = _round_up(B, bt)
    tp = _round_up(T, tc)

    # ---- Hoisted input projection: one big matmul outside the recurrence,
    # directly in the padded gate-block layout (pad the small weights, not the
    # large (T, B, 3H) activation).  r/z biases from BOTH b_ih and b_hh are
    # folded in; b_hn must stay inside the r*(...) term, so it is passed to the
    # kernel separately.  Zero padding keeps the math exact: padded hidden
    # columns see zero weights/inputs and stay zero.
    w_ih_g = jnp.transpose(w_ih.reshape(3, H, I), (2, 0, 1))        # (I, gate, H)
    w_ih_g = jnp.pad(w_ih_g, ((0, 0), (0, 0), (0, hp - H)))
    w_ih_g = w_ih_g.reshape(I, 3 * hp).astype(f32)

    b_comb = b_ih + jnp.concatenate(
        [b_hh[:2 * H], jnp.zeros((H,), b_hh.dtype)])
    b_comb = jnp.pad(b_comb.reshape(3, H), ((0, 0), (0, hp - H)))
    b_comb = b_comb.reshape(3 * hp).astype(f32)

    x_p = jnp.pad(x.astype(f32), ((0, tp - T), (0, bp - B), (0, 0)))
    gx = jnp.dot(x_p, w_ih_g, preferred_element_type=f32) + b_comb  # (tp, bp, 3*hp)

    # (3H, H) -> (Hp, 3*Hp): column block g holds W_hg^T, zero-padded.
    whh = jnp.transpose(w_hh.reshape(3, H, H), (2, 0, 1)).astype(f32)  # (in, gate, out)
    whh = jnp.pad(whh, ((0, hp - H), (0, 0), (0, hp - H))).reshape(hp, 3 * hp)
    bhn = jnp.pad(b_hh[2 * H:3 * H].astype(f32), (0, hp - H)).reshape(1, hp)
    # NOTE(perf): whh/bhn are grid-invariant; pipeline_mode=pl.Buffered(1) on
    # their specs would avoid double-buffering them for very large H.

    grid = (bp // bt, tp // tc)
    kernel = functools.partial(_gru_recurrence_kernel, hp=hp, time_chunk=tc)

    vmem_limit = int(min(max(2 * vmem_est(bt, tc), 16 * 1024 * 1024),
                         100 * 1024 * 1024))

    out = pl.pallas_call(
        kernel,
        out_shape=jax.ShapeDtypeStruct((tp, bp, hp), f32),
        grid_spec=pltpu.PrefetchScalarGridSpec(
            num_scalar_prefetch=0,
            grid=grid,
            in_specs=[
                pl.BlockSpec((tc, bt, 3 * hp), lambda b, c: (c, b, 0)),
                pl.BlockSpec((hp, 3 * hp), lambda b, c: (0, 0)),
                pl.BlockSpec((1, hp), lambda b, c: (0, 0)),
            ],
            out_specs=pl.BlockSpec((tc, bt, hp), lambda b, c: (c, b, 0)),
            scratch_shapes=[pltpu.VMEM((bt, hp), f32)],
        ),
        compiler_params=pltpu.CompilerParams(
            # batch tiles are independent (megacore-parallel on v7x);
            # the time axis is a serial recurrence.
            dimension_semantics=("parallel", "arbitrary"),
            vmem_limit_bytes=vmem_limit,
        ),
    )(gx, whh, bhn)

    return out[:T, :B, :H]


def gru_reference(x, w_ih, w_hh, b_ih, b_hh):
    """Pure-JAX reference matching torch.nn.GRU semantics (single layer, h0=0)."""
    T, B, I = x.shape
    H = w_hh.shape[1]
    w_ir, w_iz, w_in = jnp.split(w_ih, 3, axis=0)
    w_hr, w_hz, w_hn = jnp.split(w_hh, 3, axis=0)
    b_ir, b_iz, b_in = jnp.split(b_ih, 3)
    b_hr, b_hz, b_hn = jnp.split(b_hh, 3)

    def step(h, x_t):
        r = jax.nn.sigmoid(x_t @ w_ir.T + b_ir + h @ w_hr.T + b_hr)
        z = jax.nn.sigmoid(x_t @ w_iz.T + b_iz + h @ w_hz.T + b_hz)
        n = jnp.tanh(x_t @ w_in.T + b_in + r * (h @ w_hn.T + b_hn))
        h_new = (1.0 - z) * n + z * h
        return h_new, h_new

    h0 = jnp.zeros((B, H), jnp.float32)
    _, outs = lax.scan(step, h0, x)
    return outs


if __name__ == "__main__":
    T, B, I, H = 8, 2, 4, 32  # seq=8, batch=2, input_size=4, hidden_size=32

    key = jax.random.PRNGKey(0)
    k_x, k_wih, k_whh, k_bih, k_bhh = jax.random.split(key, 5)

    # deterministic init mimicking PyTorch: U(-1/sqrt(H), 1/sqrt(H))
    bound = 1.0 / math.sqrt(H)
    x = jax.random.normal(k_x, (T, B, I), dtype=jnp.float32)
    w_ih = jax.random.uniform(k_wih, (3 * H, I), jnp.float32, -bound, bound)
    w_hh = jax.random.uniform(k_whh, (3 * H, H), jnp.float32, -bound, bound)
    b_ih = jax.random.uniform(k_bih, (3 * H,), jnp.float32, -bound, bound)
    b_hh = jax.random.uniform(k_bhh, (3 * H,), jnp.float32, -bound, bound)

    out = jax.block_until_ready(controller_forward(x, w_ih, w_hh, b_ih, b_hh))
    ref = jax.block_until_ready(gru_reference(x, w_ih, w_hh, b_ih, b_hh))

    assert out.shape == (T, B, H)
    assert jnp.allclose(out, ref, atol=2e-5, rtol=2e-5), "mismatch vs JAX reference"

    print("KERNEL_OK")
</pallas_src>

<mosaic_0001>
module attributes {stable_mosaic.version = 11 : i64} {
  func.func @_gru_recurrence_kernel(%arg0: i32, %arg1: i32, %arg2: memref<8x8x384xf32, #tpu.memory_space<vmem>>, %arg3: memref<128x384xf32, #tpu.memory_space<vmem>>, %arg4: memref<1x128xf32, #tpu.memory_space<vmem>>, %arg5: memref<8x8x128xf32, #tpu.memory_space<vmem>>, %arg6: memref<8x128xf32, #tpu.memory_space<vmem>>) attributes {dimension_semantics = [#tpu.dimension_semantics<parallel>, #tpu.dimension_semantics<arbitrary>], iteration_bounds = array<i64: 1, 1>, scalar_prefetch = 0 : i64, scratch_operands = 1 : i64, tpu.core_type = #tpu.core_type<tc>, window_params = [{transform_indices = @transform_0, window_bounds = array<i64: 8, 8, 384>}, {pipeline_mode = #tpu.pipeline_mode<synchronous>, transform_indices = @transform_1, window_bounds = array<i64: 128, 384>}, {pipeline_mode = #tpu.pipeline_mode<synchronous>, transform_indices = @transform_2, window_bounds = array<i64: 1, 128>}, {transform_indices = @transform_3, window_bounds = array<i64: 8, 8, 128>}]} {
    %c0_i32 = arith.constant 0 : i32
    %0 = arith.cmpi eq, %arg1, %c0_i32 : i32
    %1 = arith.extui %0 : i1 to i32
    %c0_i32_0 = arith.constant 0 : i32
    %2 = arith.cmpi ne, %1, %c0_i32_0 : i32
    scf.if %2 {
      %cst_100 = arith.constant 0.000000e+00 : f32
      %309 = vector.broadcast %cst_100 : f32 to vector<8x128xf32>
      %c0_101 = arith.constant 0 : index
      %c0_102 = arith.constant 0 : index
      %310 = vector.load %arg6[%c0_101, %c0_102] : memref<8x128xf32, #tpu.memory_space<vmem>>, vector<8x128xf32>
      tpu.vector_store %arg6[%c0_101, %c0_102], %309 {strides = array<i32>} : memref<8x128xf32, #tpu.memory_space<vmem>>, vector<8x128xf32>,
    } else {
    }
    %c0 = arith.constant 0 : index
    %c0_1 = arith.constant 0 : index
    %3 = vector.load %arg3[%c0, %c0_1] : memref<128x384xf32, #tpu.memory_space<vmem>>, vector<128x384xf32>
    %c0_2 = arith.constant 0 : index
    %c0_3 = arith.constant 0 : index
    %4 = vector.load %arg4[%c0_2, %c0_3] : memref<1x128xf32, #tpu.memory_space<vmem>>, vector<1x128xf32>
    %c0_i32_4 = arith.constant 0 : i32
    %c0_5 = arith.constant 0 : index
    %c0_6 = arith.constant 0 : index
    %5 = vector.load %arg6[%c0_5, %c0_6] : memref<8x128xf32, #tpu.memory_space<vmem>>, vector<8x128xf32>
    %cst = arith.constant dense<0.000000e+00> : vector<8x384xf32>
    %6 = tpu.matmul %5, %3, %cst {dimension_numbers = #tpu.dot_dimension_numbers<[1], [0], [0], [1], [0, 0, 1, 1], [], []>} : vector<8x128xf32>, vector<128x384xf32>, vector<8x384xf32> -> vector<8x384xf32>
    %7 = arith.index_cast %c0_i32_4 : i32 to index
    %c0_7 = arith.constant 0 : index
    %c0_8 = arith.constant 0 : index
    %8 = vector.load %arg2[%7, %c0_7, %c0_8] : memref<8x8x384xf32, #tpu.memory_space<vmem>>, vector<1x8x384xf32>
    %9 = vector.shape_cast %8 : vector<1x8x384xf32> to vector<8x384xf32>
    %10 = vector.extract_strided_slice %9 {offsets = [0, 0], sizes = [8, 128], strides = [1, 1]} : vector<8x384xf32> to vector<8x128xf32>
    %11 = vector.extract_strided_slice %6 {offsets = [0, 0], sizes = [8, 128], strides = [1, 1]} : vector<8x384xf32> to vector<8x128xf32>
    %12 = arith.addf %10, %11 : vector<8x128xf32>
    %13 = arith.negf %12 : vector<8x128xf32>
    %14 = math.exp %13 : vector<8x128xf32>
    %cst_9 = arith.constant 1.000000e+00 : f32
    %15 = vector.broadcast %cst_9 : f32 to vector<8x128xf32>
    %16 = arith.addf %15, %14 : vector<8x128xf32>
    %17 = arith.divf %15, %16 : vector<8x128xf32>
    %18 = vector.extract_strided_slice %9 {offsets = [0, 128], sizes = [8, 128], strides = [1, 1]} : vector<8x384xf32> to vector<8x128xf32>
    %19 = vector.extract_strided_slice %6 {offsets = [0, 128], sizes = [8, 128], strides = [1, 1]} : vector<8x384xf32> to vector<8x128xf32>
    %20 = arith.addf %18, %19 : vector<8x128xf32>
    %21 = arith.negf %20 : vector<8x128xf32>
    %22 = math.exp %21 : vector<8x128xf32>
    %cst_10 = arith.constant 1.000000e+00 : f32
    %23 = vector.broadcast %cst_10 : f32 to vector<8x128xf32>
    %24 = arith.addf %23, %22 : vector<8x128xf32>
    %25 = arith.divf %23, %24 : vector<8x128xf32>
    %26 = vector.extract_strided_slice %9 {offsets = [0, 256], sizes = [8, 128], strides = [1, 1]} : vector<8x384xf32> to vector<8x128xf32>
    %27 = vector.extract_strided_slice %6 {offsets = [0, 256], sizes = [8, 128], strides = [1, 1]} : vector<8x384xf32> to vector<8x128xf32>
    %28 = vector.broadcast %4 : vector<1x128xf32> to vector<8x128xf32>
    %29 = arith.addf %27, %28 : vector<8x128xf32>
    %30 = arith.mulf %17, %29 : vector<8x128xf32>
    %31 = arith.addf %26, %30 : vector<8x128xf32>
    %32 = math.tanh %31 : vector<8x128xf32>
    %cst_11 = arith.constant 1.000000e+00 : f32
    %33 = vector.broadcast %cst_11 : f32 to vector<8x128xf32>
    %34 = arith.subf %33, %25 : vector<8x128xf32>
    %35 = arith.mulf %34, %32 : vector<8x128xf32>
    %36 = arith.mulf %25, %5 : vector<8x128xf32>
    %37 = arith.addf %35, %36 : vector<8x128xf32>
    %c0_12 = arith.constant 0 : index
    %c0_13 = arith.constant 0 : index
    %38 = vector.load %arg6[%c0_12, %c0_13] : memref<8x128xf32, #tpu.memory_space<vmem>>, vector<8x128xf32>
    tpu.vector_store %arg6[%c0_12, %c0_13], %37 {strides = array<i32>} : memref<8x128xf32, #tpu.memory_space<vmem>>, vector<8x128xf32>,
    %39 = arith.index_cast %c0_i32_4 : i32 to index
    %c0_14 = arith.constant 0 : index
    %c0_15 = arith.constant 0 : index
    %40 = vector.load %arg5[%39, %c0_14, %c0_15] : memref<8x8x128xf32, #tpu.memory_space<vmem>>, vector<1x8x128xf32>
    %41 = vector.shape_cast %40 : vector<1x8x128xf32> to vector<8x128xf32>
    %42 = vector.shape_cast %37 : vector<8x128xf32> to vector<1x8x128xf32>
    tpu.vector_store %arg5[%39, %c0_14, %c0_15], %42 {strides = array<i32>} : memref<8x8x128xf32, #tpu.memory_space<vmem>>, vector<1x8x128xf32>,
    %c1_i32 = arith.constant 1 : i32
    %c0_16 = arith.constant 0 : index
    %c0_17 = arith.constant 0 : index
    %43 = vector.load %arg6[%c0_16, %c0_17] : memref<8x128xf32, #tpu.memory_space<vmem>>, vector<8x128xf32>
    %cst_18 = arith.constant dense<0.000000e+00> : vector<8x384xf32>
    %44 = tpu.matmul %43, %3, %cst_18 {dimension_numbers = #tpu.dot_dimension_numbers<[1], [0], [0], [1], [0, 0, 1, 1], [], []>} : vector<8x128xf32>, vector<128x384xf32>, vector<8x384xf32> -> vector<8x384xf32>
    %45 = arith.index_cast %c1_i32 : i32 to index
    %c0_19 = arith.constant 0 : index
    %c0_20 = arith.constant 0 : index
    %46 = vector.load %arg2[%45, %c0_19, %c0_20] : memref<8x8x384xf32, #tpu.memory_space<vmem>>, vector<1x8x384xf32>
    %47 = vector.shape_cast %46 : vector<1x8x384xf32> to vector<8x384xf32>
    %48 = vector.extract_strided_slice %47 {offsets = [0, 0], sizes = [8, 128], strides = [1, 1]} : vector<8x384xf32> to vector<8x128xf32>
    %49 = vector.extract_strided_slice %44 {offsets = [0, 0], sizes = [8, 128], strides = [1, 1]} : vector<8x384xf32> to vector<8x128xf32>
    %50 = arith.addf %48, %49 : vector<8x128xf32>
    %51 = arith.negf %50 : vector<8x128xf32>
    %52 = math.exp %51 : vector<8x128xf32>
    %cst_21 = arith.constant 1.000000e+00 : f32
    %53 = vector.broadcast %cst_21 : f32 to vector<8x128xf32>
    %54 = arith.addf %53, %52 : vector<8x128xf32>
    %55 = arith.divf %53, %54 : vector<8x128xf32>
    %56 = vector.extract_strided_slice %47 {offsets = [0, 128], sizes = [8, 128], strides = [1, 1]} : vector<8x384xf32> to vector<8x128xf32>
    %57 = vector.extract_strided_slice %44 {offsets = [0, 128], sizes = [8, 128], strides = [1, 1]} : vector<8x384xf32> to vector<8x128xf32>
    %58 = arith.addf %56, %57 : vector<8x128xf32>
    %59 = arith.negf %58 : vector<8x128xf32>
    %60 = math.exp %59 : vector<8x128xf32>
    %cst_22 = arith.constant 1.000000e+00 : f32
    %61 = vector.broadcast %cst_22 : f32 to vector<8x128xf32>
    %62 = arith.addf %61, %60 : vector<8x128xf32>
    %63 = arith.divf %61, %62 : vector<8x128xf32>
    %64 = vector.extract_strided_slice %47 {offsets = [0, 256], sizes = [8, 128], strides = [1, 1]} : vector<8x384xf32> to vector<8x128xf32>
    %65 = vector.extract_strided_slice %44 {offsets = [0, 256], sizes = [8, 128], strides = [1, 1]} : vector<8x384xf32> to vector<8x128xf32>
    %66 = vector.broadcast %4 : vector<1x128xf32> to vector<8x128xf32>
    %67 = arith.addf %65, %66 : vector<8x128xf32>
    %68 = arith.mulf %55, %67 : vector<8x128xf32>
    %69 = arith.addf %64, %68 : vector<8x128xf32>
    %70 = math.tanh %69 : vector<8x128xf32>
    %cst_23 = arith.constant 1.000000e+00 : f32
    %71 = vector.broadcast %cst_23 : f32 to vector<8x128xf32>
    %72 = arith.subf %71, %63 : vector<8x128xf32>
    %73 = arith.mulf %72, %70 : vector<8x128xf32>
    %74 = arith.mulf %63, %43 : vector<8x128xf32>
    %75 = arith.addf %73, %74 : vector<8x128xf32>
    %c0_24 = arith.constant 0 : index
    %c0_25 = arith.constant 0 : index
    %76 = vector.load %arg6[%c0_24, %c0_25] : memref<8x128xf32, #tpu.memory_space<vmem>>, vector<8x128xf32>
    tpu.vector_store %arg6[%c0_24, %c0_25], %75 {strides = array<i32>} : memref<8x128xf32, #tpu.memory_space<vmem>>, vector<8x128xf32>,
    %77 = arith.index_cast %c1_i32 : i32 to index
    %c0_26 = arith.constant 0 : index
    %c0_27 = arith.constant 0 : index
    %78 = vector.load %arg5[%77, %c0_26, %c0_27] : memref<8x8x128xf32, #tpu.memory_space<vmem>>, vector<1x8x128xf32>
    %79 = vector.shape_cast %78 : vector<1x8x128xf32> to vector<8x128xf32>
    %80 = vector.shape_cast %75 : vector<8x128xf32> to vector<1x8x128xf32>
    tpu.vector_store %arg5[%77, %c0_26, %c0_27], %80 {strides = array<i32>} : memref<8x8x128xf32, #tpu.memory_space<vmem>>, vector<1x8x128xf32>,
    %c2_i32 = arith.constant 2 : i32
    %c0_28 = arith.constant 0 : index
    %c0_29 = arith.constant 0 : index
    %81 = vector.load %arg6[%c0_28, %c0_29] : memref<8x128xf32, #tpu.memory_space<vmem>>, vector<8x128xf32>
    %cst_30 = arith.constant dense<0.000000e+00> : vector<8x384xf32>
    %82 = tpu.matmul %81, %3, %cst_30 {dimension_numbers = #tpu.dot_dimension_numbers<[1], [0], [0], [1], [0, 0, 1, 1], [], []>} : vector<8x128xf32>, vector<128x384xf32>, vector<8x384xf32> -> vector<8x384xf32>
    %83 = arith.index_cast %c2_i32 : i32 to index
    %c0_31 = arith.constant 0 : index
    %c0_32 = arith.constant 0 : index
    %84 = vector.load %arg2[%83, %c0_31, %c0_32] : memref<8x8x384xf32, #tpu.memory_space<vmem>>, vector<1x8x384xf32>
    %85 = vector.shape_cast %84 : vector<1x8x384xf32> to vector<8x384xf32>
    %86 = vector.extract_strided_slice %85 {offsets = [0, 0], sizes = [8, 128], strides = [1, 1]} : vector<8x384xf32> to vector<8x128xf32>
    %87 = vector.extract_strided_slice %82 {offsets = [0, 0], sizes = [8, 128], strides = [1, 1]} : vector<8x384xf32> to vector<8x128xf32>
    %88 = arith.addf %86, %87 : vector<8x128xf32>
    %89 = arith.negf %88 : vector<8x128xf32>
    %90 = math.exp %89 : vector<8x128xf32>
    %cst_33 = arith.constant 1.000000e+00 : f32
    %91 = vector.broadcast %cst_33 : f32 to vector<8x128xf32>
    %92 = arith.addf %91, %90 : vector<8x128xf32>
    %93 = arith.divf %91, %92 : vector<8x128xf32>
    %94 = vector.extract_strided_slice %85 {offsets = [0, 128], sizes = [8, 128], strides = [1, 1]} : vector<8x384xf32> to vector<8x128xf32>
    %95 = vector.extract_strided_slice %82 {offsets = [0, 128], sizes = [8, 128], strides = [1, 1]} : vector<8x384xf32> to vector<8x128xf32>
    %96 = arith.addf %94, %95 : vector<8x128xf32>
    %97 = arith.negf %96 : vector<8x128xf32>
    %98 = math.exp %97 : vector<8x128xf32>
    %cst_34 = arith.constant 1.000000e+00 : f32
    %99 = vector.broadcast %cst_34 : f32 to vector<8x128xf32>
    %100 = arith.addf %99, %98 : vector<8x128xf32>
    %101 = arith.divf %99, %100 : vector<8x128xf32>
    %102 = vector.extract_strided_slice %85 {offsets = [0, 256], sizes = [8, 128], strides = [1, 1]} : vector<8x384xf32> to vector<8x128xf32>
    %103 = vector.extract_strided_slice %82 {offsets = [0, 256], sizes = [8, 128], strides = [1, 1]} : vector<8x384xf32> to vector<8x128xf32>
    %104 = vector.broadcast %4 : vector<1x128xf32> to vector<8x128xf32>
    %105 = arith.addf %103, %104 : vector<8x128xf32>
    %106 = arith.mulf %93, %105 : vector<8x128xf32>
    %107 = arith.addf %102, %106 : vector<8x128xf32>
    %108 = math.tanh %107 : vector<8x128xf32>
    %cst_35 = arith.constant 1.000000e+00 : f32
    %109 = vector.broadcast %cst_35 : f32 to vector<8x128xf32>
    %110 = arith.subf %109, %101 : vector<8x128xf32>
    %111 = arith.mulf %110, %108 : vector<8x128xf32>
    %112 = arith.mulf %101, %81 : vector<8x128xf32>
    %113 = arith.addf %111, %112 : vector<8x128xf32>
    %c0_36 = arith.constant 0 : index
    %c0_37 = arith.constant 0 : index
    %114 = vector.load %arg6[%c0_36, %c0_37] : memref<8x128xf32, #tpu.memory_space<vmem>>, vector<8x128xf32>
    tpu.vector_store %arg6[%c0_36, %c0_37], %113 {strides = array<i32>} : memref<8x128xf32, #tpu.memory_space<vmem>>, vector<8x128xf32>,
    %115 = arith.index_cast %c2_i32 : i32 to index
    %c0_38 = arith.constant 0 : index
    %c0_39 = arith.constant 0 : index
    %116 = vector.load %arg5[%115, %c0_38, %c0_39] : memref<8x8x128xf32, #tpu.memory_space<vmem>>, vector<1x8x128xf32>
    %117 = vector.shape_cast %116 : vector<1x8x128xf32> to vector<8x128xf32>
    %118 = vector.shape_cast %113 : vector<8x128xf32> to vector<1x8x128xf32>
    tpu.vector_store %arg5[%115, %c0_38, %c0_39], %118 {strides = array<i32>} : memref<8x8x128xf32, #tpu.memory_space<vmem>>, vector<1x8x128xf32>,
    %c3_i32 = arith.constant 3 : i32
    %c0_40 = arith.constant 0 : index
    %c0_41 = arith.constant 0 : index
    %119 = vector.load %arg6[%c0_40, %c0_41] : memref<8x128xf32, #tpu.memory_space<vmem>>, vector<8x128xf32>
    %cst_42 = arith.constant dense<0.000000e+00> : vector<8x384xf32>
    %120 = tpu.matmul %119, %3, %cst_42 {dimension_numbers = #tpu.dot_dimension_numbers<[1], [0], [0], [1], [0, 0, 1, 1], [], []>} : vector<8x128xf32>, vector<128x384xf32>, vector<8x384xf32> -> vector<8x384xf32>
    %121 = arith.index_cast %c3_i32 : i32 to index
    %c0_43 = arith.constant 0 : index
    %c0_44 = arith.constant 0 : index
    %122 = vector.load %arg2[%121, %c0_43, %c0_44] : memref<8x8x384xf32, #tpu.memory_space<vmem>>, vector<1x8x384xf32>
    %123 = vector.shape_cast %122 : vector<1x8x384xf32> to vector<8x384xf32>
    %124 = vector.extract_strided_slice %123 {offsets = [0, 0], sizes = [8, 128], strides = [1, 1]} : vector<8x384xf32> to vector<8x128xf32>
    %125 = vector.extract_strided_slice %120 {offsets = [0, 0], sizes = [8, 128], strides = [1, 1]} : vector<8x384xf32> to vector<8x128xf32>
    %126 = arith.addf %124, %125 : vector<8x128xf32>
    %127 = arith.negf %126 : vector<8x128xf32>
    %128 = math.exp %127 : vector<8x128xf32>
    %cst_45 = arith.constant 1.000000e+00 : f32
    %129 = vector.broadcast %cst_45 : f32 to vector<8x128xf32>
    %130 = arith.addf %129, %128 : vector<8x128xf32>
    %131 = arith.divf %129, %130 : vector<8x128xf32>
    %132 = vector.extract_strided_slice %123 {offsets = [0, 128], sizes = [8, 128], strides = [1, 1]} : vector<8x384xf32> to vector<8x128xf32>
    %133 = vector.extract_strided_slice %120 {offsets = [0, 128], sizes = [8, 128], strides = [1, 1]} : vector<8x384xf32> to vector<8x128xf32>
    %134 = arith.addf %132, %133 : vector<8x128xf32>
    %135 = arith.negf %134 : vector<8x128xf32>
    %136 = math.exp %135 : vector<8x128xf32>
    %cst_46 = arith.constant 1.000000e+00 : f32
    %137 = vector.broadcast %cst_46 : f32 to vector<8x128xf32>
    %138 = arith.addf %137, %136 : vector<8x128xf32>
    %139 = arith.divf %137, %138 : vector<8x128xf32>
    %140 = vector.extract_strided_slice %123 {offsets = [0, 256], sizes = [8, 128], strides = [1, 1]} : vector<8x384xf32> to vector<8x128xf32>
    %141 = vector.extract_strided_slice %120 {offsets = [0, 256], sizes = [8, 128], strides = [1, 1]} : vector<8x384xf32> to vector<8x128xf32>
    %142 = vector.broadcast %4 : vector<1x128xf32> to vector<8x128xf32>
    %143 = arith.addf %141, %142 : vector<8x128xf32>
    %144 = arith.mulf %131, %143 : vector<8x128xf32>
    %145 = arith.addf %140, %144 : vector<8x128xf32>
    %146 = math.tanh %145 : vector<8x128xf32>
    %cst_47 = arith.constant 1.000000e+00 : f32
    %147 = vector.broadcast %cst_47 : f32 to vector<8x128xf32>
    %148 = arith.subf %147, %139 : vector<8x128xf32>
    %149 = arith.mulf %148, %146 : vector<8x128xf32>
    %150 = arith.mulf %139, %119 : vector<8x128xf32>
    %151 = arith.addf %149, %150 : vector<8x128xf32>
    %c0_48 = arith.constant 0 : index
    %c0_49 = arith.constant 0 : index
    %152 = vector.load %arg6[%c0_48, %c0_49] : memref<8x128xf32, #tpu.memory_space<vmem>>, vector<8x128xf32>
    tpu.vector_store %arg6[%c0_48, %c0_49], %151 {strides = array<i32>} : memref<8x128xf32, #tpu.memory_space<vmem>>, vector<8x128xf32>,
    %153 = arith.index_cast %c3_i32 : i32 to index
    %c0_50 = arith.constant 0 : index
    %c0_51 = arith.constant 0 : index
    %154 = vector.load %arg5[%153, %c0_50, %c0_51] : memref<8x8x128xf32, #tpu.memory_space<vmem>>, vector<1x8x128xf32>
    %155 = vector.shape_cast %154 : vector<1x8x128xf32> to vector<8x128xf32>
    %156 = vector.shape_cast %151 : vector<8x128xf32> to vector<1x8x128xf32>
    tpu.vector_store %arg5[%153, %c0_50, %c0_51], %156 {strides = array<i32>} : memref<8x8x128xf32, #tpu.memory_space<vmem>>, vector<1x8x128xf32>,
    %c4_i32 = arith.constant 4 : i32
    %c0_52 = arith.constant 0 : index
    %c0_53 = arith.constant 0 : index
    %157 = vector.load %arg6[%c0_52, %c0_53] : memref<8x128xf32, #tpu.memory_space<vmem>>, vector<8x128xf32>
    %cst_54 = arith.constant dense<0.000000e+00> : vector<8x384xf32>
    %158 = tpu.matmul %157, %3, %cst_54 {dimension_numbers = #tpu.dot_dimension_numbers<[1], [0], [0], [1], [0, 0, 1, 1], [], []>} : vector<8x128xf32>, vector<128x384xf32>, vector<8x384xf32> -> vector<8x384xf32>
    %159 = arith.index_cast %c4_i32 : i32 to index
    %c0_55 = arith.constant 0 : index
    %c0_56 = arith.constant 0 : index
    %160 = vector.load %arg2[%159, %c0_55, %c0_56] : memref<8x8x384xf32, #tpu.memory_space<vmem>>, vector<1x8x384xf32>
    %161 = vector.shape_cast %160 : vector<1x8x384xf32> to vector<8x384xf32>
    %162 = vector.extract_strided_slice %161 {offsets = [0, 0], sizes = [8, 128], strides = [1, 1]} : vector<8x384xf32> to vector<8x128xf32>
    %163 = vector.extract_strided_slice %158 {offsets = [0, 0], sizes = [8, 128], strides = [1, 1]} : vector<8x384xf32> to vector<8x128xf32>
    %164 = arith.addf %162, %163 : vector<8x128xf32>
    %165 = arith.negf %164 : vector<8x128xf32>
    %166 = math.exp %165 : vector<8x128xf32>
    %cst_57 = arith.constant 1.000000e+00 : f32
    %167 = vector.broadcast %cst_57 : f32 to vector<8x128xf32>
    %168 = arith.addf %167, %166 : vector<8x128xf32>
    %169 = arith.divf %167, %168 : vector<8x128xf32>
    %170 = vector.extract_strided_slice %161 {offsets = [0, 128], sizes = [8, 128], strides = [1, 1]} : vector<8x384xf32> to vector<8x128xf32>
    %171 = vector.extract_strided_slice %158 {offsets = [0, 128], sizes = [8, 128], strides = [1, 1]} : vector<8x384xf32> to vector<8x128xf32>
    %172 = arith.addf %170, %171 : vector<8x128xf32>
    %173 = arith.negf %172 : vector<8x128xf32>
    %174 = math.exp %173 : vector<8x128xf32>
    %cst_58 = arith.constant 1.000000e+00 : f32
    %175 = vector.broadcast %cst_58 : f32 to vector<8x128xf32>
    %176 = arith.addf %175, %174 : vector<8x128xf32>
    %177 = arith.divf %175, %176 : vector<8x128xf32>
    %178 = vector.extract_strided_slice %161 {offsets = [0, 256], sizes = [8, 128], strides = [1, 1]} : vector<8x384xf32> to vector<8x128xf32>
    %179 = vector.extract_strided_slice %158 {offsets = [0, 256], sizes = [8, 128], strides = [1, 1]} : vector<8x384xf32> to vector<8x128xf32>
    %180 = vector.broadcast %4 : vector<1x128xf32> to vector<8x128xf32>
    %181 = arith.addf %179, %180 : vector<8x128xf32>
    %182 = arith.mulf %169, %181 : vector<8x128xf32>
    %183 = arith.addf %178, %182 : vector<8x128xf32>
    %184 = math.tanh %183 : vector<8x128xf32>
    %cst_59 = arith.constant 1.000000e+00 : f32
    %185 = vector.broadcast %cst_59 : f32 to vector<8x128xf32>
    %186 = arith.subf %185, %177 : vector<8x128xf32>
    %187 = arith.mulf %186, %184 : vector<8x128xf32>
    %188 = arith.mulf %177, %157 : vector<8x128xf32>
    %189 = arith.addf %187, %188 : vector<8x128xf32>
    %c0_60 = arith.constant 0 : index
    %c0_61 = arith.constant 0 : index
    %190 = vector.load %arg6[%c0_60, %c0_61] : memref<8x128xf32, #tpu.memory_space<vmem>>, vector<8x128xf32>
    tpu.vector_store %arg6[%c0_60, %c0_61], %189 {strides = array<i32>} : memref<8x128xf32, #tpu.memory_space<vmem>>, vector<8x128xf32>,
    %191 = arith.index_cast %c4_i32 : i32 to index
    %c0_62 = arith.constant 0 : index
    %c0_63 = arith.constant 0 : index
    %192 = vector.load %arg5[%191, %c0_62, %c0_63] : memref<8x8x128xf32, #tpu.memory_space<vmem>>, vector<1x8x128xf32>
    %193 = vector.shape_cast %192 : vector<1x8x128xf32> to vector<8x128xf32>
    %194 = vector.shape_cast %189 : vector<8x128xf32> to vector<1x8x128xf32>
    tpu.vector_store %arg5[%191, %c0_62, %c0_63], %194 {strides = array<i32>} : memref<8x8x128xf32, #tpu.memory_space<vmem>>, vector<1x8x128xf32>,
    %c5_i32 = arith.constant 5 : i32
    %c0_64 = arith.constant 0 : index
    %c0_65 = arith.constant 0 : index
    %195 = vector.load %arg6[%c0_64, %c0_65] : memref<8x128xf32, #tpu.memory_space<vmem>>, vector<8x128xf32>
    %cst_66 = arith.constant dense<0.000000e+00> : vector<8x384xf32>
    %196 = tpu.matmul %195, %3, %cst_66 {dimension_numbers = #tpu.dot_dimension_numbers<[1], [0], [0], [1], [0, 0, 1, 1], [], []>} : vector<8x128xf32>, vector<128x384xf32>, vector<8x384xf32> -> vector<8x384xf32>
    %197 = arith.index_cast %c5_i32 : i32 to index
    %c0_67 = arith.constant 0 : index
    %c0_68 = arith.constant 0 : index
    %198 = vector.load %arg2[%197, %c0_67, %c0_68] : memref<8x8x384xf32, #tpu.memory_space<vmem>>, vector<1x8x384xf32>
    %199 = vector.shape_cast %198 : vector<1x8x384xf32> to vector<8x384xf32>
    %200 = vector.extract_strided_slice %199 {offsets = [0, 0], sizes = [8, 128], strides = [1, 1]} : vector<8x384xf32> to vector<8x128xf32>
    %201 = vector.extract_strided_slice %196 {offsets = [0, 0], sizes = [8, 128], strides = [1, 1]} : vector<8x384xf32> to vector<8x128xf32>
    %202 = arith.addf %200, %201 : vector<8x128xf32>
    %203 = arith.negf %202 : vector<8x128xf32>
    %204 = math.exp %203 : vector<8x128xf32>
    %cst_69 = arith.constant 1.000000e+00 : f32
    %205 = vector.broadcast %cst_69 : f32 to vector<8x128xf32>
    %206 = arith.addf %205, %204 : vector<8x128xf32>
    %207 = arith.divf %205, %206 : vector<8x128xf32>
    %208 = vector.extract_strided_slice %199 {offsets = [0, 128], sizes = [8, 128], strides = [1, 1]} : vector<8x384xf32> to vector<8x128xf32>
    %209 = vector.extract_strided_slice %196 {offsets = [0, 128], sizes = [8, 128], strides = [1, 1]} : vector<8x384xf32> to vector<8x128xf32>
    %210 = arith.addf %208, %209 : vector<8x128xf32>
    %211 = arith.negf %210 : vector<8x128xf32>
    %212 = math.exp %211 : vector<8x128xf32>
    %cst_70 = arith.constant 1.000000e+00 : f32
    %213 = vector.broadcast %cst_70 : f32 to vector<8x128xf32>
    %214 = arith.addf %213, %212 : vector<8x128xf32>
    %215 = arith.divf %213, %214 : vector<8x128xf32>
    %216 = vector.extract_strided_slice %199 {offsets = [0, 256], sizes = [8, 128], strides = [1, 1]} : vector<8x384xf32> to vector<8x128xf32>
    %217 = vector.extract_strided_slice %196 {offsets = [0, 256], sizes = [8, 128], strides = [1, 1]} : vector<8x384xf32> to vector<8x128xf32>
    %218 = vector.broadcast %4 : vector<1x128xf32> to vector<8x128xf32>
    %219 = arith.addf %217, %218 : vector<8x128xf32>
    %220 = arith.mulf %207, %219 : vector<8x128xf32>
    %221 = arith.addf %216, %220 : vector<8x128xf32>
    %222 = math.tanh %221 : vector<8x128xf32>
    %cst_71 = arith.constant 1.000000e+00 : f32
    %223 = vector.broadcast %cst_71 : f32 to vector<8x128xf32>
    %224 = arith.subf %223, %215 : vector<8x128xf32>
    %225 = arith.mulf %224, %222 : vector<8x128xf32>
    %226 = arith.mulf %215, %195 : vector<8x128xf32>
    %227 = arith.addf %225, %226 : vector<8x128xf32>
    %c0_72 = arith.constant 0 : index
    %c0_73 = arith.constant 0 : index
    %228 = vector.load %arg6[%c0_72, %c0_73] : memref<8x128xf32, #tpu.memory_space<vmem>>, vector<8x128xf32>
    tpu.vector_store %arg6[%c0_72, %c0_73], %227 {strides = array<i32>} : memref<8x128xf32, #tpu.memory_space<vmem>>, vector<8x128xf32>,
    %229 = arith.index_cast %c5_i32 : i32 to index
    %c0_74 = arith.constant 0 : index
    %c0_75 = arith.constant 0 : index
    %230 = vector.load %arg5[%229, %c0_74, %c0_75] : memref<8x8x128xf32, #tpu.memory_space<vmem>>, vector<1x8x128xf32>
    %231 = vector.shape_cast %230 : vector<1x8x128xf32> to vector<8x128xf32>
    %232 = vector.shape_cast %227 : vector<8x128xf32> to vector<1x8x128xf32>
    tpu.vector_store %arg5[%229, %c0_74, %c0_75], %232 {strides = array<i32>} : memref<8x8x128xf32, #tpu.memory_space<vmem>>, vector<1x8x128xf32>,
    %c6_i32 = arith.constant 6 : i32
    %c0_76 = arith.constant 0 : index
    %c0_77 = arith.constant 0 : index
    %233 = vector.load %arg6[%c0_76, %c0_77] : memref<8x128xf32, #tpu.memory_space<vmem>>, vector<8x128xf32>
    %cst_78 = arith.constant dense<0.000000e+00> : vector<8x384xf32>
    %234 = tpu.matmul %233, %3, %cst_78 {dimension_numbers = #tpu.dot_dimension_numbers<[1], [0], [0], [1], [0, 0, 1, 1], [], []>} : vector<8x128xf32>, vector<128x384xf32>, vector<8x384xf32> -> vector<8x384xf32>
    %235 = arith.index_cast %c6_i32 : i32 to index
    %c0_79 = arith.constant 0 : index
    %c0_80 = arith.constant 0 : index
    %236 = vector.load %arg2[%235, %c0_79, %c0_80] : memref<8x8x384xf32, #tpu.memory_space<vmem>>, vector<1x8x384xf32>
    %237 = vector.shape_cast %236 : vector<1x8x384xf32> to vector<8x384xf32>
    %238 = vector.extract_strided_slice %237 {offsets = [0, 0], sizes = [8, 128], strides = [1, 1]} : vector<8x384xf32> to vector<8x128xf32>
    %239 = vector.extract_strided_slice %234 {offsets = [0, 0], sizes = [8, 128], strides = [1, 1]} : vector<8x384xf32> to vector<8x128xf32>
    %240 = arith.addf %238, %239 : vector<8x128xf32>
    %241 = arith.negf %240 : vector<8x128xf32>
    %242 = math.exp %241 : vector<8x128xf32>
    %cst_81 = arith.constant 1.000000e+00 : f32
    %243 = vector.broadcast %cst_81 : f32 to vector<8x128xf32>
    %244 = arith.addf %243, %242 : vector<8x128xf32>
    %245 = arith.divf %243, %244 : vector<8x128xf32>
    %246 = vector.extract_strided_slice %237 {offsets = [0, 128], sizes = [8, 128], strides = [1, 1]} : vector<8x384xf32> to vector<8x128xf32>
    %247 = vector.extract_strided_slice %234 {offsets = [0, 128], sizes = [8, 128], strides = [1, 1]} : vector<8x384xf32> to vector<8x128xf32>
    %248 = arith.addf %246, %247 : vector<8x128xf32>
    %249 = arith.negf %248 : vector<8x128xf32>
    %250 = math.exp %249 : vector<8x128xf32>
    %cst_82 = arith.constant 1.000000e+00 : f32
    %251 = vector.broadcast %cst_82 : f32 to vector<8x128xf32>
    %252 = arith.addf %251, %250 : vector<8x128xf32>
    %253 = arith.divf %251, %252 : vector<8x128xf32>
    %254 = vector.extract_strided_slice %237 {offsets = [0, 256], sizes = [8, 128], strides = [1, 1]} : vector<8x384xf32> to vector<8x128xf32>
    %255 = vector.extract_strided_slice %234 {offsets = [0, 256], sizes = [8, 128], strides = [1, 1]} : vector<8x384xf32> to vector<8x128xf32>
    %256 = vector.broadcast %4 : vector<1x128xf32> to vector<8x128xf32>
    %257 = arith.addf %255, %256 : vector<8x128xf32>
    %258 = arith.mulf %245, %257 : vector<8x128xf32>
    %259 = arith.addf %254, %258 : vector<8x128xf32>
    %260 = math.tanh %259 : vector<8x128xf32>
    %cst_83 = arith.constant 1.000000e+00 : f32
    %261 = vector.broadcast %cst_83 : f32 to vector<8x128xf32>
    %262 = arith.subf %261, %253 : vector<8x128xf32>
    %263 = arith.mulf %262, %260 : vector<8x128xf32>
    %264 = arith.mulf %253, %233 : vector<8x128xf32>
    %265 = arith.addf %263, %264 : vector<8x128xf32>
    %c0_84 = arith.constant 0 : index
    %c0_85 = arith.constant 0 : index
    %266 = vector.load %arg6[%c0_84, %c0_85] : memref<8x128xf32, #tpu.memory_space<vmem>>, vector<8x128xf32>
    tpu.vector_store %arg6[%c0_84, %c0_85], %265 {strides = array<i32>} : memref<8x128xf32, #tpu.memory_space<vmem>>, vector<8x128xf32>,
    %267 = arith.index_cast %c6_i32 : i32 to index
    %c0_86 = arith.constant 0 : index
    %c0_87 = arith.constant 0 : index
    %268 = vector.load %arg5[%267, %c0_86, %c0_87] : memref<8x8x128xf32, #tpu.memory_space<vmem>>, vector<1x8x128xf32>
    %269 = vector.shape_cast %268 : vector<1x8x128xf32> to vector<8x128xf32>
    %270 = vector.shape_cast %265 : vector<8x128xf32> to vector<1x8x128xf32>
    tpu.vector_store %arg5[%267, %c0_86, %c0_87], %270 {strides = array<i32>} : memref<8x8x128xf32, #tpu.memory_space<vmem>>, vector<1x8x128xf32>,
    %c7_i32 = arith.constant 7 : i32
    %c0_88 = arith.constant 0 : index
    %c0_89 = arith.constant 0 : index
    %271 = vector.load %arg6[%c0_88, %c0_89] : memref<8x128xf32, #tpu.memory_space<vmem>>, vector<8x128xf32>
    %cst_90 = arith.constant dense<0.000000e+00> : vector<8x384xf32>
    %272 = tpu.matmul %271, %3, %cst_90 {dimension_numbers = #tpu.dot_dimension_numbers<[1], [0], [0], [1], [0, 0, 1, 1], [], []>} : vector<8x128xf32>, vector<128x384xf32>, vector<8x384xf32> -> vector<8x384xf32>
    %273 = arith.index_cast %c7_i32 : i32 to index
    %c0_91 = arith.constant 0 : index
    %c0_92 = arith.constant 0 : index
    %274 = vector.load %arg2[%273, %c0_91, %c0_92] : memref<8x8x384xf32, #tpu.memory_space<vmem>>, vector<1x8x384xf32>
    %275 = vector.shape_cast %274 : vector<1x8x384xf32> to vector<8x384xf32>
    %276 = vector.extract_strided_slice %275 {offsets = [0, 0], sizes = [8, 128], strides = [1, 1]} : vector<8x384xf32> to vector<8x128xf32>
    %277 = vector.extract_strided_slice %272 {offsets = [0, 0], sizes = [8, 128], strides = [1, 1]} : vector<8x384xf32> to vector<8x128xf32>
    %278 = arith.addf %276, %277 : vector<8x128xf32>
    %279 = arith.negf %278 : vector<8x128xf32>
    %280 = math.exp %279 : vector<8x128xf32>
    %cst_93 = arith.constant 1.000000e+00 : f32
    %281 = vector.broadcast %cst_93 : f32 to vector<8x128xf32>
    %282 = arith.addf %281, %280 : vector<8x128xf32>
    %283 = arith.divf %281, %282 : vector<8x128xf32>
    %284 = vector.extract_strided_slice %275 {offsets = [0, 128], sizes = [8, 128], strides = [1, 1]} : vector<8x384xf32> to vector<8x128xf32>
    %285 = vector.extract_strided_slice %272 {offsets = [0, 128], sizes = [8, 128], strides = [1, 1]} : vector<8x384xf32> to vector<8x128xf32>
    %286 = arith.addf %284, %285 : vector<8x128xf32>
    %287 = arith.negf %286 : vector<8x128xf32>
    %288 = math.exp %287 : vector<8x128xf32>
    %cst_94 = arith.constant 1.000000e+00 : f32
    %289 = vector.broadcast %cst_94 : f32 to vector<8x128xf32>
    %290 = arith.addf %289, %288 : vector<8x128xf32>
    %291 = arith.divf %289, %290 : vector<8x128xf32>
    %292 = vector.extract_strided_slice %275 {offsets = [0, 256], sizes = [8, 128], strides = [1, 1]} : vector<8x384xf32> to vector<8x128xf32>
    %293 = vector.extract_strided_slice %272 {offsets = [0, 256], sizes = [8, 128], strides = [1, 1]} : vector<8x384xf32> to vector<8x128xf32>
    %294 = vector.broadcast %4 : vector<1x128xf32> to vector<8x128xf32>
    %295 = arith.addf %293, %294 : vector<8x128xf32>
    %296 = arith.mulf %283, %295 : vector<8x128xf32>
    %297 = arith.addf %292, %296 : vector<8x128xf32>
    %298 = math.tanh %297 : vector<8x128xf32>
    %cst_95 = arith.constant 1.000000e+00 : f32
    %299 = vector.broadcast %cst_95 : f32 to vector<8x128xf32>
    %300 = arith.subf %299, %291 : vector<8x128xf32>
    %301 = arith.mulf %300, %298 : vector<8x128xf32>
    %302 = arith.mulf %291, %271 : vector<8x128xf32>
    %303 = arith.addf %301, %302 : vector<8x128xf32>
    %c0_96 = arith.constant 0 : index
    %c0_97 = arith.constant 0 : index
    %304 = vector.load %arg6[%c0_96, %c0_97] : memref<8x128xf32, #tpu.memory_space<vmem>>, vector<8x128xf32>
    tpu.vector_store %arg6[%c0_96, %c0_97], %303 {strides = array<i32>} : memref<8x128xf32, #tpu.memory_space<vmem>>, vector<8x128xf32>,
    %305 = arith.index_cast %c7_i32 : i32 to index
    %c0_98 = arith.constant 0 : index
    %c0_99 = arith.constant 0 : index
    %306 = vector.load %arg5[%305, %c0_98, %c0_99] : memref<8x8x128xf32, #tpu.memory_space<vmem>>, vector<1x8x128xf32>
    %307 = vector.shape_cast %306 : vector<1x8x128xf32> to vector<8x128xf32>
    %308 = vector.shape_cast %303 : vector<8x128xf32> to vector<1x8x128xf32>
    tpu.vector_store %arg5[%305, %c0_98, %c0_99], %308 {strides = array<i32>} : memref<8x8x128xf32, #tpu.memory_space<vmem>>, vector<1x8x128xf32>,
    %c8_i32 = arith.constant 8 : i32
    return
  }
  func.func @transform_0(%arg0: i32, %arg1: i32) -> (i32, i32, i32) {
    %c0_i32 = arith.constant 0 : i32
    %c0_i32_0 = arith.constant 0 : i32
    return %arg1, %arg0, %c0_i32 : i32, i32, i32
  }
  func.func @transform_1(%arg0: i32, %arg1: i32) -> (i32, i32) {
    %c0_i32 = arith.constant 0 : i32
    %c0_i32_0 = arith.constant 0 : i32
    %c0_i32_1 = arith.constant 0 : i32
    return %c0_i32, %c0_i32_0 : i32, i32
  }
  func.func @transform_2(%arg0: i32, %arg1: i32) -> (i32, i32) {
    %c0_i32 = arith.constant 0 : i32
    %c0_i32_0 = arith.constant 0 : i32
    %c0_i32_1 = arith.constant 0 : i32
    return %c0_i32, %c0_i32_0 : i32, i32
  }
  func.func @transform_3(%arg0: i32, %arg1: i32) -> (i32, i32, i32) {
    %c0_i32 = arith.constant 0 : i32
    %c0_i32_0 = arith.constant 0 : i32
    return %arg1, %arg0, %c0_i32 : i32, i32, i32
  }
}

</mosaic_0001>

<bundles_post_ra>
// kernel: controller_forward.1
= control target key start
LH: loop header
LB: loop body
LE: loop exit
PB: predicated region body
PF: predicated region fallthrough
CT: control target
= control target key end

     0   :  { %v3226_v3 = vmov 0.0   ;;  %vm2037_vm0 = vmmov 0   ;;  %s3222_s1 = inlined_call_operand.vmem [shape: f32[128,384], index: 1, kind: input, shape index: {}]   ;;  %s3223_s0 = inlined_call_operand.vmem [shape: f32[8,8,384], index: 0, kind: input, shape index: {}]   ;;  %s3224_s2 = inlined_call_operand.vmem [shape: f32[1,128], index: 2, kind: input, shape index: {}]   ;;  %s3225_s3 = inlined_call_operand.vmem [shape: f32[8,8,128], index: 3, kind: output, shape index: {}]  }
   0x1   :  { %v2061_v0 = vld [vmem:[%s3222_s1 + $0x170] sm:$0xff]  ;;  %v2066_v1 = vld [vmem:[%s3222_s1 + $0x168] sm:$0xff]  ;;  %v2071_v2 = vld [vmem:[%s3222_s1 + $0x158] sm:$0xff]  ;;  %1625 = vmatprep.subr.mxu1 %v3226_v3  ;;  %133 = vmatprep.mubr.f32.mxu0 %v3226_v3 }
   0x2   :  { %3236 = vst [vmem:[#allocation3_spill] sm:$0xff] %v2061_v0  ;;  %69 = vmatprep.subr.mxu0 %v2061_v0  ;;  %v2079_v4 = vld [vmem:[%s3222_s1 + $0x150] sm:$0xff]  ;;  %1657 = vmatprep.mubr.msk.f32.mxu1 %vm2037_vm0, %v3226_v3  ;;  %v2087_v5 = vld [vmem:[%s3222_s1 + $0x140] sm:$0xff]  ;;  %v2093_v6 = vld [vmem:[%s3222_s1 + $0x138] sm:$0xff] }
   0x3   :  { %70 = vmatpush1.msra.mxu0 %v2066_v1  ;;  %v2099_v7 = vld [vmem:[%s3222_s1 + $0x128] sm:$0xff]  ;;  %v2105_v8 = vld [vmem:[%s3222_s1 + $0x120] sm:$0xff]  ;;  %v2111_v9 = vld [vmem:[%s3222_s1 + $0x110] sm:$0xff] }
   0x4   :  { %71 = vmatprep.subr.mxu0 %v2071_v2  ;;  %v2117_v10 = vld [vmem:[%s3222_s1 + $0x108] sm:$0xff]  ;;  %v2123_v11 = vld [vmem:[%s3222_s1 + $0xf8] sm:$0xff]  ;;  %v2129_v12 = vld [vmem:[%s3222_s1 + $0xf0] sm:$0xff] }
   0x5   :  { %72 = vmatpush1.msra.mxu0 %v2079_v4  ;;  %v2135_v13 = vld [vmem:[%s3222_s1 + $0xe0] sm:$0xff]  ;;  %v2140_v14 = vld [vmem:[%s3222_s1 + $0x178] sm:$0xff]  ;;  %v2158_v17 = vld [vmem:[%s3222_s1 + $0xc8] sm:$0xff] }
   0x6   :  { %73 = vmatprep.subr.mxu0 %v2087_v5  ;;  %v2146_v15 = vld [vmem:[%s3222_s1 + $0xd8] sm:$0xff]  ;;  %1626 = vmatpush3.msra.mxu1 %v2140_v14  ;;  %v2152_v16 = vld [vmem:[%s3222_s1 + $0x160] sm:$0xff]  ;;  %v2164_v18 = vld [vmem:[%s3222_s1 + $0x148] sm:$0xff] }
   0x7   :  { %74 = vmatpush1.msra.mxu0 %v2093_v6  ;;  %1627 = vmatprep.subr.mxu1 %v3226_v3  ;;  %v2170_v19 = vld [vmem:[%s3222_s1 + $0xc0] sm:$0xff]  ;;  %v2177_v20 = vld [vmem:[%s3222_s1 + $0xb0] sm:$0xff]  ;;  %v2189_v22 = vld [vmem:[%s3222_s1 + $0xa8] sm:$0xff] }
   0x8   :  { %75 = vmatprep.subr.mxu0 %v2099_v7  ;;  %1628 = vmatpush3.msra.mxu1 %v2152_v16  ;;  %v2183_v21 = vld [vmem:[%s3222_s1 + $0x130] sm:$0xff]  ;;  %v2196_v23 = vld [vmem:[%s3222_s1 + $0x98] sm:$0xff]  ;;  %v2215_v26 = vld [vmem:[%s3222_s1 + $0x80] sm:$0xff] }
   0x9   :  { %76 = vmatpush1.msra.mxu0 %v2105_v8  ;;  %1629 = vmatprep.subr.mxu1 %v3226_v3  ;;  %v2202_v24 = vld [vmem:[%s3222_s1 + $0x118] sm:$0xff]  ;;  %v2208_v25 = vld [vmem:[%s3222_s1 + $0x90] sm:$0xff]  ;;  %v2221_v27 = vld [vmem:[%s3222_s1 + $0x100] sm:$0xff] }
   0xa   :  { %77 = vmatprep.subr.mxu0 %v2111_v9  ;;  %1630 = vmatpush3.msra.mxu1 %v2164_v18  ;;  %v2227_v28 = vld [vmem:[%s3222_s1 + $0x78] sm:$0xff]  ;;  %v2234_v29 = vld [vmem:[%s3222_s1 + $0x68] sm:$0xff]  ;;  %v2246_v31 = vld [vmem:[%s3222_s1 + $0x60] sm:$0xff] }
   0xb   :  { %78 = vmatpush1.msra.mxu0 %v2117_v10  ;;  %1631 = vmatprep.subr.mxu1 %v3226_v3  ;;  %v2240_v30 = vld [vmem:[%s3222_s1 + $0xe8] sm:$0xff]  ;;  %v2253_v32 = vld [vmem:[%s3222_s1 + $0x50] sm:$0xff]  ;;  %v2272_v35 = vld [vmem:[%s3222_s1 + $0x38] sm:$0xff] }
   0xc   :  { %79 = vmatprep.subr.mxu0 %v2123_v11  ;;  %1632 = vmatpush3.msra.mxu1 %v2183_v21  ;;  %v2259_v33 = vld [vmem:[%s3222_s1 + $0xd0] sm:$0xff]  ;;  %v2265_v34 = vld [vmem:[%s3222_s1 + $0x48] sm:$0xff]  ;;  %v2278_v36 = vld [vmem:[%s3222_s1 + $0xb8] sm:$0xff] }
   0xd   :  { %80 = vmatpush1.msra.mxu0 %v2129_v12  ;;  %1633 = vmatprep.subr.mxu1 %v3226_v3  ;;  %v2284_v37 = vld [vmem:[%s3222_s1 + $0x30] sm:$0xff]  ;;  %v2291_v38 = vld [vmem:[%s3222_s1 + $0x20] sm:$0xff]  ;;  %v2303_v40 = vld [vmem:[%s3222_s1 + $0x18] sm:$0xff] }
   0xe   :  { %81 = vmatprep.subr.mxu0 %v2135_v13  ;;  %1634 = vmatpush3.msra.mxu1 %v2202_v24  ;;  %v2297_v39 = vld [vmem:[%s3222_s1 + $0xa0] sm:$0xff]  ;;  %v2310_v41 = vld [vmem:[%s3222_s1 + $0x8] sm:$0xff]  ;;  %v2330_v44 = vld [vmem:[%s3222_s1 + $0x70] sm:$0xff] }
   0xf   :  { %82 = vmatpush1.msra.mxu0 %v2146_v15  ;;  %1635 = vmatprep.subr.mxu1 %v3226_v3  ;;  %v2316_v42 = vld [vmem:[%s3222_s1 + $0x88] sm:$0xff]  ;;  %v2322_v43 = vld [vmem:[%s3222_s1] sm:$0xff]  ;;  %v2339_v45 = vld [vmem:[%s3222_s1 + $0x58] sm:$0xff] }
  0x10   :  { %83 = vmatprep.subr.mxu0 %v2158_v17  ;;  %1636 = vmatpush3.msra.mxu1 %v2221_v27  ;;  %3237 = vst [vmem:[#allocation4_spill] sm:$0xff] %v2322_v43  ;;  %v2347_v46 = vld [vmem:[%s3222_s1 + $0x40] sm:$0xff]  ;;  %v2356_v47 = vld [vmem:[%s3222_s1 + $0x28] sm:$0xff]  ;;  %v2365_v48 = vld [vmem:[%s3222_s1 + $0x10] sm:$0xff] }
  0x11   :  { %84 = vmatpush1.msra.mxu0 %v2170_v19  ;;  %1637 = vmatprep.subr.mxu1 %v3226_v3  ;;  %3238 = vst [vmem:[#allocation5_spill] sm:$0xff] %v2365_v48  ;;  %v210_v49 = vld [vmem:[%s3223_s0] sm:$0xff]  ;;  %v211_v54 = vld [vmem:[%s3223_s0 + $0x8] sm:$0xff] }
  0x12   :  { %85 = vmatprep.subr.mxu0 %v2177_v20  ;;  %1638 = vmatpush3.msra.mxu1 %v2240_v30  ;;  %v2445_v62 = vld [vmem:[%s3224_s2] ss:$0 sm:$0xff] }
  0x13   :  { %86 = vmatpush1.msra.mxu0 %v2189_v22  ;;  %1639 = vmatprep.subr.mxu1 %v3226_v3 }
  0x14   :  { %87 = vmatprep.subr.mxu0 %v2196_v23  ;;  %1640 = vmatpush3.msra.mxu1 %v2259_v33 }
  0x15   :  { %88 = vmatpush1.msra.mxu0 %v2208_v25  ;;  %1641 = vmatprep.subr.mxu1 %v3226_v3 }
  0x16   :  { %89 = vmatprep.subr.mxu0 %v2215_v26  ;;  %1642 = vmatpush3.msra.mxu1 %v2278_v36 }
  0x17   :  { %90 = vmatpush1.msra.mxu0 %v2227_v28  ;;  %1643 = vmatprep.subr.mxu1 %v3226_v3 }
  0x18   :  { %91 = vmatprep.subr.mxu0 %v2234_v29  ;;  %1644 = vmatpush3.msra.mxu1 %v2297_v39 }
  0x19   :  { %92 = vmatpush1.msra.mxu0 %v2246_v31  ;;  %1645 = vmatprep.subr.mxu1 %v3226_v3 }
  0x1a   :  { %93 = vmatprep.subr.mxu0 %v2253_v32  ;;  %1646 = vmatpush3.msra.mxu1 %v2316_v42 }
  0x1b   :  { %94 = vmatpush1.msra.mxu0 %v2265_v34  ;;  %1647 = vmatprep.subr.mxu1 %v3226_v3 }
  0x1c   :  { %95 = vmatprep.subr.mxu0 %v2272_v35  ;;  %1648 = vmatpush3.msra.mxu1 %v2330_v44 }
  0x1d   :  { %96 = vmatpush1.msra.mxu0 %v2284_v37  ;;  %1649 = vmatprep.subr.mxu1 %v3226_v3 }
  0x1e   :  { %97 = vmatprep.subr.mxu0 %v2291_v38  ;;  %1650 = vmatpush3.msra.mxu1 %v2339_v45 }
  0x1f   :  { %98 = vmatpush1.msra.mxu0 %v2303_v40  ;;  %1651 = vmatprep.subr.mxu1 %v3226_v3 }
  0x20   :  { %99 = vmatprep.subr.mxu0 %v2310_v41  ;;  %1652 = vmatpush3.msra.mxu1 %v2347_v46 }
  0x21   :  { %100 = vmatpush1.msra.mxu0 %v2322_v43  ;;  %1653 = vmatprep.subr.mxu1 %v3226_v3 }
  0x22   :  { %134 = vmatmul.mubr.f32.vlgmr.msra.gmra.mxu0 %v3226_v3  ;;  %244 = vmatprep.subr.mxu0 %v2061_v0 }
  0x23   :  { %245 = vmatpush1.msra.mxu0 %v2066_v1  ;;  %1654 = vmatpush3.msra.mxu1 %v2356_v47 }
  0x24   :  { %246 = vmatprep.subr.mxu0 %v2071_v2  ;;  %1655 = vmatprep.subr.mxu1 %v3226_v3 }
  0x25   :  { %247 = vmatpush1.msra.mxu0 %v2079_v4  ;;  %1656 = vmatpush3.msra.mxu1 %v2365_v48 }
  0x26   :  { %248 = vmatprep.subr.mxu0 %v2087_v5  ;;  %1658 = vmatmul.mubr.f32.vlgmr.msra.gmra.mxu1 %v3226_v3 }
  0x27   :  { %249 = vmatpush1.msra.mxu0 %v2093_v6  ;;  %1660 = vmatprep.subr.mxu1 %v3226_v3 }
  0x28   :  { %250 = vmatprep.subr.mxu0 %v2099_v7  ;;  %1661 = vmatpush3.msra.mxu1 %v2140_v14 }
  0x29   :  { %251 = vmatpush1.msra.mxu0 %v2105_v8  ;;  %1662 = vmatprep.subr.mxu1 %v3226_v3 }
  0x2a   :  { %252 = vmatprep.subr.mxu0 %v2111_v9  ;;  %1663 = vmatpush3.msra.mxu1 %v2152_v16 }
  0x2b   :  { %253 = vmatpush1.msra.mxu0 %v2117_v10  ;;  %1664 = vmatprep.subr.mxu1 %v3226_v3 }
  0x2c   :  { %254 = vmatprep.subr.mxu0 %v2123_v11  ;;  %1665 = vmatpush3.msra.mxu1 %v2164_v18 }
  0x2d   :  { %255 = vmatpush1.msra.mxu0 %v2129_v12  ;;  %1666 = vmatprep.subr.mxu1 %v3226_v3 }
  0x2e   :  { %256 = vmatprep.subr.mxu0 %v2135_v13  ;;  %1667 = vmatpush3.msra.mxu1 %v2183_v21 }
  0x2f   :  { %257 = vmatpush1.msra.mxu0 %v2146_v15  ;;  %1668 = vmatprep.subr.mxu1 %v3226_v3 }
  0x30   :  { %258 = vmatprep.subr.mxu0 %v2158_v17  ;;  %1669 = vmatpush3.msra.mxu1 %v2202_v24 }
  0x31   :  { %259 = vmatpush1.msra.mxu0 %v2170_v19  ;;  %1670 = vmatprep.subr.mxu1 %v3226_v3 }
  0x32   :  { %260 = vmatprep.subr.mxu0 %v2177_v20  ;;  %1671 = vmatpush3.msra.mxu1 %v2221_v27 }
  0x33   :  { %261 = vmatpush1.msra.mxu0 %v2189_v22  ;;  %1672 = vmatprep.subr.mxu1 %v3226_v3 }
  0x34   :  { %262 = vmatprep.subr.mxu0 %v2196_v23  ;;  %1673 = vmatpush3.msra.mxu1 %v2240_v30 }
  0x35   :  { %263 = vmatpush1.msra.mxu0 %v2208_v25  ;;  %1674 = vmatprep.subr.mxu1 %v3226_v3 }
  0x36   :  { %264 = vmatprep.subr.mxu0 %v2215_v26  ;;  %1675 = vmatpush3.msra.mxu1 %v2259_v33 }
  0x37   :  { %265 = vmatpush1.msra.mxu0 %v2227_v28  ;;  %1676 = vmatprep.subr.mxu1 %v3226_v3 }
  0x38   :  { %266 = vmatprep.subr.mxu0 %v2234_v29  ;;  %1677 = vmatpush3.msra.mxu1 %v2278_v36 }
  0x39   :  { %267 = vmatpush1.msra.mxu0 %v2246_v31  ;;  %1678 = vmatprep.subr.mxu1 %v3226_v3 }
  0x3a   :  { %268 = vmatprep.subr.mxu0 %v2253_v32  ;;  %1679 = vmatpush3.msra.mxu1 %v2297_v39 }
  0x3b   :  { %269 = vmatpush1.msra.mxu0 %v2265_v34  ;;  %1680 = vmatprep.subr.mxu1 %v3226_v3 }
  0x3c   :  { %270 = vmatprep.subr.mxu0 %v2272_v35  ;;  %1681 = vmatpush3.msra.mxu1 %v2316_v42 }
  0x3d   :  { %271 = vmatpush1.msra.mxu0 %v2284_v37  ;;  %1682 = vmatprep.subr.mxu1 %v3226_v3 }
  0x3e   :  { %272 = vmatprep.subr.mxu0 %v2291_v38  ;;  %1683 = vmatpush3.msra.mxu1 %v2330_v44 }
  0x3f   :  { %273 = vmatpush1.msra.mxu0 %v2303_v40  ;;  %1684 = vmatprep.subr.mxu1 %v3226_v3 }
  0x40   :  { %274 = vmatprep.subr.mxu0 %v2310_v41  ;;  %1685 = vmatpush3.msra.mxu1 %v2339_v45 }
  0x41   :  { %275 = vmatpush1.msra.mxu0 %v2322_v43  ;;  %308 = vmatprep.mubr.f32.mxu0 %v3226_v3 }
  0x42   :  { %1686 = vmatprep.subr.mxu1 %v3226_v3  ;;  %1692 = vmatprep.mubr.msk.f32.mxu1 %vm2037_vm0, %v3226_v3 }
  0x43   :  { %1687 = vmatpush3.msra.mxu1 %v2347_v46  ;;  %415 = vmatprep.subr.mxu0 %v2061_v0 }
  0x44   :  { %1688 = vmatprep.subr.mxu1 %v3226_v3 }
  0x45   :  { %1689 = vmatpush3.msra.mxu1 %v2356_v47 }
  0x46   :  { %1690 = vmatprep.subr.mxu1 %v3226_v3 }
  0x47   :  { %1691 = vmatpush3.msra.mxu1 %v2365_v48 }
  0x48   :  { %1695 = vmatprep.subr.mxu1 %v3226_v3 }
  0xe2   :  { %v135_v50 = vpop.f32.mrf.mxu0 }
  0xe3   :  { %v213_v51 = vadd.f32 %v210_v49, %v135_v50 }
  0xe4   :  { %v137_v53 = vpop.f32.mrf.mxu0 }
  0xe5   :  { %v1444_v52 = vmul.f32 -1.442695, %v213_v51  ;;  %v220_v55 = vadd.f32 %v211_v54, %v137_v53  ;;  %v212_v51 = vld [vmem:[%s3223_s0 + $0x10] sm:$0xff] }
  0xe6   :  { %v206_v56 = vpop.f32.mrf.mxu1 }
  0xe7   :  { %1907 = vpow2.f32 %v1444_v52  ;;  %v1445_v57 = vmul.f32 -1.442695, %v220_v55  ;;  %v233_v49 = vadd.f32 %v2445_v62, %v206_v56  ;;  %v1447_v56 = vld [vmem:[%s3223_s0 + $0x18] sm:$0xff] }
  0xe8   :  { %v1659_v58 = vpop.f32.mrf.mxu1 }
  0xe9   :  { %1909 = vpow2.f32 %v1445_v57 }
  0xf4   :  { %v1908_v59 = vpop.eup %1907 }
  0xf5   :  { %v217_v60 = vadd.f32 1.0, %v1908_v59 }
  0xf6   :  { %v1910_v61 = vpop.eup %1909 }
  0xf7   :  { %1911 = vrcp.f32 %v217_v60  ;;  %v224_v63 = vadd.f32 1.0, %v1910_v61 }
  0xf9   :  { %1913 = vrcp.f32 %v224_v63 }
 0x104   :  { %v1912_v50 = vpop.eup %1911 }
 0x105   :  { %v234_v52 = vmul.f32 %v1912_v50, %v233_v49 }
 0x106   :  { %v1914_v54 = vpop.eup %1913 }
 0x107   :  { %v235_v53 = vadd.f32 %v234_v52, %v212_v51  ;;  %v237_v55 = vsub.f32 1.0, %v1914_v54  ;;  %v239_v59 = vmul.f32 0.0, %v1914_v54 }
 0x109   :  { %1915 = vtanh.f32 %v235_v53  ;;  %v1448_v53 = vld [vmem:[%s3223_s0 + $0x20] sm:$0xff] }
 0x116   :  { %v1916_v57 = vpop.eup %1915 }
 0x117   :  { %v238_v58 = vmul.f32 %v1916_v57, %v237_v55 }
 0x119   :  { %v2451_v60 = vadd.f32 %v239_v59, %v238_v58 }
 0x11b   :  { %242 = vst [vmem:[%s3225_s3] sm:$0xff] %v2451_v60  ;;  %309 = vmatmul.mubr.f32.vlgmr.msra.gmra.mxu0 %v2451_v60  ;;  %1693 = vmatmul.mubr.f32.vlgmr.msra.gmra.mxu1 %v2451_v60 }
 0x11c   :  { %416 = vmatpush1.msra.mxu0 %v2066_v1  ;;  %1696 = vmatpush3.msra.mxu1 %v2140_v14 }
 0x11d   :  { %417 = vmatprep.subr.mxu0 %v2071_v2  ;;  %1697 = vmatprep.subr.mxu1 %v3226_v3 }
 0x11e   :  { %418 = vmatpush1.msra.mxu0 %v2079_v4  ;;  %1698 = vmatpush3.msra.mxu1 %v2152_v16 }
 0x11f   :  { %419 = vmatprep.subr.mxu0 %v2087_v5  ;;  %1699 = vmatprep.subr.mxu1 %v3226_v3 }
 0x120   :  { %420 = vmatpush1.msra.mxu0 %v2093_v6  ;;  %1700 = vmatpush3.msra.mxu1 %v2164_v18 }
 0x121   :  { %421 = vmatprep.subr.mxu0 %v2099_v7  ;;  %1701 = vmatprep.subr.mxu1 %v3226_v3 }
 0x122   :  { %422 = vmatpush1.msra.mxu0 %v2105_v8  ;;  %1702 = vmatpush3.msra.mxu1 %v2183_v21 }
 0x123   :  { %423 = vmatprep.subr.mxu0 %v2111_v9  ;;  %1703 = vmatprep.subr.mxu1 %v3226_v3 }
 0x124   :  { %424 = vmatpush1.msra.mxu0 %v2117_v10  ;;  %1704 = vmatpush3.msra.mxu1 %v2202_v24 }
 0x125   :  { %425 = vmatprep.subr.mxu0 %v2123_v11  ;;  %1705 = vmatprep.subr.mxu1 %v3226_v3 }
 0x126   :  { %426 = vmatpush1.msra.mxu0 %v2129_v12  ;;  %1706 = vmatpush3.msra.mxu1 %v2221_v27 }
 0x127   :  { %427 = vmatprep.subr.mxu0 %v2135_v13  ;;  %1707 = vmatprep.subr.mxu1 %v3226_v3 }
 0x128   :  { %428 = vmatpush1.msra.mxu0 %v2146_v15  ;;  %1708 = vmatpush3.msra.mxu1 %v2240_v30 }
 0x129   :  { %429 = vmatprep.subr.mxu0 %v2158_v17  ;;  %1709 = vmatprep.subr.mxu1 %v3226_v3 }
 0x12a   :  { %430 = vmatpush1.msra.mxu0 %v2170_v19  ;;  %1710 = vmatpush3.msra.mxu1 %v2259_v33 }
 0x12b   :  { %431 = vmatprep.subr.mxu0 %v2177_v20  ;;  %1711 = vmatprep.subr.mxu1 %v3226_v3 }
 0x12c   :  { %432 = vmatpush1.msra.mxu0 %v2189_v22  ;;  %1712 = vmatpush3.msra.mxu1 %v2278_v36 }
 0x12d   :  { %433 = vmatprep.subr.mxu0 %v2196_v23  ;;  %1713 = vmatprep.subr.mxu1 %v3226_v3 }
 0x12e   :  { %434 = vmatpush1.msra.mxu0 %v2208_v25  ;;  %1714 = vmatpush3.msra.mxu1 %v2297_v39 }
 0x12f   :  { %435 = vmatprep.subr.mxu0 %v2215_v26  ;;  %1715 = vmatprep.subr.mxu1 %v3226_v3 }
 0x130   :  { %436 = vmatpush1.msra.mxu0 %v2227_v28  ;;  %1716 = vmatpush3.msra.mxu1 %v2316_v42 }
 0x131   :  { %437 = vmatprep.subr.mxu0 %v2234_v29  ;;  %1717 = vmatprep.subr.mxu1 %v3226_v3 }
 0x132   :  { %438 = vmatpush1.msra.mxu0 %v2246_v31  ;;  %1718 = vmatpush3.msra.mxu1 %v2330_v44 }
 0x133   :  { %439 = vmatprep.subr.mxu0 %v2253_v32  ;;  %1719 = vmatprep.subr.mxu1 %v3226_v3 }
 0x134   :  { %440 = vmatpush1.msra.mxu0 %v2265_v34  ;;  %1720 = vmatpush3.msra.mxu1 %v2339_v45 }
 0x135   :  { %441 = vmatprep.subr.mxu0 %v2272_v35  ;;  %1721 = vmatprep.subr.mxu1 %v3226_v3 }
 0x136   :  { %442 = vmatpush1.msra.mxu0 %v2284_v37  ;;  %1722 = vmatpush3.msra.mxu1 %v2347_v46 }
 0x137   :  { %443 = vmatprep.subr.mxu0 %v2291_v38  ;;  %1723 = vmatprep.subr.mxu1 %v3226_v3 }
 0x138   :  { %444 = vmatpush1.msra.mxu0 %v2303_v40  ;;  %1724 = vmatpush3.msra.mxu1 %v2356_v47 }
 0x139   :  { %445 = vmatprep.subr.mxu0 %v2310_v41  ;;  %1725 = vmatprep.subr.mxu1 %v3226_v3 }
 0x13a   :  { %446 = vmatpush1.msra.mxu0 %v2322_v43  ;;  %479 = vmatprep.mubr.f32.mxu0 %v3226_v3 }
 0x13b   :  { %1726 = vmatpush3.msra.mxu1 %v2365_v48  ;;  %1727 = vmatprep.mubr.msk.f32.mxu1 %vm2037_vm0, %v3226_v3 }
 0x13c   :  { %586 = vmatprep.subr.mxu0 %v2061_v0  ;;  %1730 = vmatprep.subr.mxu1 %v3226_v3 }
 0x1db   :  { %v310_v61 = vpop.f32.mrf.mxu0  ;;  %v381_v63 = vpop.f32.mrf.mxu1 }
 0x1dc   :  { %v389_v49 = vadd.f32 %v1447_v56, %v310_v61  ;;  %v403_v0 = vadd.f32 %v2445_v62, %v381_v63  ;;  %v1449_v56 = vld [vmem:[%s3223_s0 + $0x28] sm:$0xff] }
 0x1dd   :  { %v1694_v50 = vpop.f32.mrf.mxu1  ;;  %v312_v52 = vpop.f32.mrf.mxu0 }
 0x1de   :  { %v1450_v51 = vmul.f32 -1.442695, %v389_v49  ;;  %v396_v54 = vadd.f32 %v1448_v53, %v312_v52 }
 0x1e0   :  { %1917 = vpow2.f32 %v1450_v51  ;;  %v1451_v55 = vmul.f32 -1.442695, %v396_v54 }
 0x1e2   :  { %1919 = vpow2.f32 %v1451_v55 }
 0x1ed   :  { %v1918_v57 = vpop.eup %1917 }
 0x1ee   :  { %v393_v58 = vadd.f32 1.0, %v1918_v57 }
 0x1ef   :  { %v1920_v59 = vpop.eup %1919 }
 0x1f0   :  { %1921 = vrcp.f32 %v393_v58  ;;  %v400_v3 = vadd.f32 1.0, %v1920_v59 }
 0x1f2   :  { %1923 = vrcp.f32 %v400_v3  ;;  %v3240_v3 = vld [vmem:[#allocation5_spill] sm:$0xff] }
 0x1fd   :  { %v1922_v48 = vpop.eup %1921 }
 0x1fe   :  { %v404_v61 = vmul.f32 %v1922_v48, %v403_v0  ;;  %v3239_v0 = vmov 0.0   ;;  %v3241_v48 = vld [vmem:[#allocation3_spill] sm:$0xff] }
 0x1ff   :  { %v1924_v50 = vpop.eup %1923 }
 0x200   :  { %v405_v49 = vadd.f32 %v1449_v56, %v404_v61  ;;  %v407_v51 = vsub.f32 1.0, %v1924_v50  ;;  %v409_v54 = vmul.f32 %v1924_v50, %v2451_v60  ;;  %v1453_v60 = vld [vmem:[%s3223_s0 + $0x30] sm:$0xff] }
 0x202   :  { %1925 = vtanh.f32 %v405_v49  ;;  %v1454_v49 = vld [vmem:[%s3223_s0 + $0x38] sm:$0xff] }
 0x20f   :  { %v1926_v52 = vpop.eup %1925 }
 0x210   :  { %v408_v53 = vmul.f32 %v1926_v52, %v407_v51 }
 0x212   :  { %v2537_v55 = vadd.f32 %v409_v54, %v408_v53 }
 0x214   :  { %1452 = vst [vmem:[%s3225_s3 + $0x8] sm:$0xff] %v2537_v55  ;;  %480 = vmatmul.mubr.f32.vlgmr.msra.gmra.mxu0 %v2537_v55  ;;  %1728 = vmatmul.mubr.f32.vlgmr.msra.gmra.mxu1 %v2537_v55 }
 0x215   :  { %587 = vmatpush1.msra.mxu0 %v2066_v1  ;;  %1731 = vmatpush3.msra.mxu1 %v2140_v14 }
 0x216   :  { %588 = vmatprep.subr.mxu0 %v2071_v2  ;;  %1732 = vmatprep.subr.mxu1 %v3239_v0 }
 0x217   :  { %589 = vmatpush1.msra.mxu0 %v2079_v4  ;;  %1733 = vmatpush3.msra.mxu1 %v2152_v16 }
 0x218   :  { %590 = vmatprep.subr.mxu0 %v2087_v5  ;;  %1734 = vmatprep.subr.mxu1 %v3239_v0 }
 0x219   :  { %591 = vmatpush1.msra.mxu0 %v2093_v6  ;;  %1735 = vmatpush3.msra.mxu1 %v2164_v18 }
 0x21a   :  { %592 = vmatprep.subr.mxu0 %v2099_v7  ;;  %1736 = vmatprep.subr.mxu1 %v3239_v0 }
 0x21b   :  { %593 = vmatpush1.msra.mxu0 %v2105_v8  ;;  %1737 = vmatpush3.msra.mxu1 %v2183_v21 }
 0x21c   :  { %594 = vmatprep.subr.mxu0 %v2111_v9  ;;  %1738 = vmatprep.subr.mxu1 %v3239_v0 }
 0x21d   :  { %595 = vmatpush1.msra.mxu0 %v2117_v10  ;;  %1739 = vmatpush3.msra.mxu1 %v2202_v24 }
 0x21e   :  { %596 = vmatprep.subr.mxu0 %v2123_v11  ;;  %1740 = vmatprep.subr.mxu1 %v3239_v0 }
 0x21f   :  { %597 = vmatpush1.msra.mxu0 %v2129_v12  ;;  %1741 = vmatpush3.msra.mxu1 %v2221_v27 }
 0x220   :  { %598 = vmatprep.subr.mxu0 %v2135_v13  ;;  %1742 = vmatprep.subr.mxu1 %v3239_v0 }
 0x221   :  { %599 = vmatpush1.msra.mxu0 %v2146_v15  ;;  %1743 = vmatpush3.msra.mxu1 %v2240_v30 }
 0x222   :  { %600 = vmatprep.subr.mxu0 %v2158_v17  ;;  %1744 = vmatprep.subr.mxu1 %v3239_v0 }
 0x223   :  { %601 = vmatpush1.msra.mxu0 %v2170_v19  ;;  %1745 = vmatpush3.msra.mxu1 %v2259_v33 }
 0x224   :  { %602 = vmatprep.subr.mxu0 %v2177_v20  ;;  %1746 = vmatprep.subr.mxu1 %v3239_v0 }
 0x225   :  { %603 = vmatpush1.msra.mxu0 %v2189_v22  ;;  %1747 = vmatpush3.msra.mxu1 %v2278_v36 }
 0x226   :  { %604 = vmatprep.subr.mxu0 %v2196_v23  ;;  %1748 = vmatprep.subr.mxu1 %v3239_v0 }
 0x227   :  { %605 = vmatpush1.msra.mxu0 %v2208_v25  ;;  %1749 = vmatpush3.msra.mxu1 %v2297_v39 }
 0x228   :  { %606 = vmatprep.subr.mxu0 %v2215_v26  ;;  %1750 = vmatprep.subr.mxu1 %v3239_v0 }
 0x229   :  { %607 = vmatpush1.msra.mxu0 %v2227_v28  ;;  %1751 = vmatpush3.msra.mxu1 %v2316_v42 }
 0x22a   :  { %608 = vmatprep.subr.mxu0 %v2234_v29  ;;  %1752 = vmatprep.subr.mxu1 %v3239_v0 }
 0x22b   :  { %609 = vmatpush1.msra.mxu0 %v2246_v31  ;;  %1753 = vmatpush3.msra.mxu1 %v2330_v44 }
 0x22c   :  { %610 = vmatprep.subr.mxu0 %v2253_v32  ;;  %1754 = vmatprep.subr.mxu1 %v3239_v0 }
 0x22d   :  { %611 = vmatpush1.msra.mxu0 %v2265_v34  ;;  %1755 = vmatpush3.msra.mxu1 %v2339_v45 }
 0x22e   :  { %612 = vmatprep.subr.mxu0 %v2272_v35  ;;  %1756 = vmatprep.subr.mxu1 %v3239_v0 }
 0x22f   :  { %613 = vmatpush1.msra.mxu0 %v2284_v37  ;;  %1757 = vmatpush3.msra.mxu1 %v2347_v46 }
 0x230   :  { %614 = vmatprep.subr.mxu0 %v2291_v38  ;;  %1758 = vmatprep.subr.mxu1 %v3239_v0 }
 0x231   :  { %615 = vmatpush1.msra.mxu0 %v2303_v40  ;;  %1759 = vmatpush3.msra.mxu1 %v2356_v47 }
 0x232   :  { %616 = vmatprep.subr.mxu0 %v2310_v41  ;;  %1760 = vmatprep.subr.mxu1 %v3239_v0 }
 0x233   :  { %617 = vmatpush1.msra.mxu0 %v2322_v43  ;;  %650 = vmatprep.mubr.f32.mxu0 %v3239_v0 }
 0x234   :  { %1761 = vmatpush3.msra.mxu1 %v3240_v3  ;;  %1762 = vmatprep.mubr.msk.f32.mxu1 %vm2037_vm0, %v3239_v0 }
 0x235   :  { %757 = vmatprep.subr.mxu0 %v3241_v48  ;;  %1765 = vmatprep.subr.mxu1 %v3239_v0 }
 0x2d4   :  { %v481_v63 = vpop.f32.mrf.mxu0  ;;  %v552_v57 = vpop.f32.mrf.mxu1 }
 0x2d5   :  { %v560_v58 = vadd.f32 %v1453_v60, %v481_v63  ;;  %v574_v3 = vadd.f32 %v2445_v62, %v552_v57  ;;  %v1455_v60 = vld [vmem:[%s3223_s0 + $0x40] sm:$0xff] }
 0x2d6   :  { %v1729_v59 = vpop.f32.mrf.mxu1  ;;  %v483_v61 = vpop.f32.mrf.mxu0 }
 0x2d7   :  { %v1456_v56 = vmul.f32 -1.442695, %v560_v58  ;;  %v567_v50 = vadd.f32 %v1454_v49, %v483_v61 }
 0x2d9   :  { %1927 = vpow2.f32 %v1456_v56  ;;  %v1457_v51 = vmul.f32 -1.442695, %v567_v50 }
 0x2db   :  { %1929 = vpow2.f32 %v1457_v51 }
 0x2e6   :  { %v1928_v52 = vpop.eup %1927 }
 0x2e7   :  { %v564_v53 = vadd.f32 1.0, %v1928_v52  ;;  %v1461_v52 = vld [vmem:[%s3223_s0 + $0x58] sm:$0xff] }
 0x2e8   :  { %v1930_v54 = vpop.eup %1929 }
 0x2e9   :  { %1931 = vrcp.f32 %v564_v53  ;;  %v571_v48 = vadd.f32 1.0, %v1930_v54 }
 0x2eb   :  { %1933 = vrcp.f32 %v571_v48 }
 0x2f6   :  { %v1932_v43 = vpop.eup %1931 }
 0x2f7   :  { %v575_v63 = vmul.f32 %v1932_v43, %v574_v3 }
 0x2f8   :  { %v1934_v59 = vpop.eup %1933 }
 0x2f9   :  { %v576_v58 = vadd.f32 %v1455_v60, %v575_v63  ;;  %v578_v56 = vsub.f32 1.0, %v1934_v59  ;;  %v580_v50 = vmul.f32 %v1934_v59, %v2537_v55 }
 0x2fb   :  { %1935 = vtanh.f32 %v576_v58 }
 0x308   :  { %v1936_v61 = vpop.eup %1935 }
 0x309   :  { %v579_v49 = vmul.f32 %v1936_v61, %v578_v56 }
 0x30b   :  { %v2623_v51 = vadd.f32 %v580_v50, %v579_v49  ;;  %v2720_v49 = vld [vmem:[%s3222_s1 + $0x168] sm:$0xff]  ;;  %v2727_v50 = vld [vmem:[%s3222_s1 + $0x158] sm:$0xff] }
 0x30d   :  { %1458 = vst [vmem:[%s3225_s3 + $0x10] sm:$0xff] %v2623_v51  ;;  %651 = vmatmul.mubr.f32.vlgmr.msra.gmra.mxu0 %v2623_v51  ;;  %1763 = vmatmul.mubr.f32.vlgmr.msra.gmra.mxu1 %v2623_v51 }
 0x30e   :  { %758 = vmatpush1.msra.mxu0 %v2066_v1  ;;  %1766 = vmatpush3.msra.mxu1 %v2140_v14  ;;  %v3242_v1 = vld [vmem:[#allocation4_spill] sm:$0xff] }
 0x30f   :  { %759 = vmatprep.subr.mxu0 %v2071_v2  ;;  %1767 = vmatprep.subr.mxu1 %v3239_v0  ;;  %v3243_v2 = vld [vmem:[#allocation5_spill] sm:$0xff] }
 0x310   :  { %760 = vmatpush1.msra.mxu0 %v2079_v4  ;;  %1768 = vmatpush3.msra.mxu1 %v2152_v16  ;;  %v3244_v4 = vld [vmem:[#allocation3_spill] sm:$0xff] }
 0x311   :  { %761 = vmatprep.subr.mxu0 %v2087_v5  ;;  %1769 = vmatprep.subr.mxu1 %v3239_v0  ;;  %v1459_v5 = vld [vmem:[%s3223_s0 + $0x48] sm:$0xff] }
 0x312   :  { %762 = vmatpush1.msra.mxu0 %v2093_v6  ;;  %1770 = vmatpush3.msra.mxu1 %v2164_v18 }
 0x313   :  { %763 = vmatprep.subr.mxu0 %v2099_v7  ;;  %1771 = vmatprep.subr.mxu1 %v3239_v0 }
 0x314   :  { %764 = vmatpush1.msra.mxu0 %v2105_v8  ;;  %1772 = vmatpush3.msra.mxu1 %v2183_v21 }
 0x315   :  { %765 = vmatprep.subr.mxu0 %v2111_v9  ;;  %1773 = vmatprep.subr.mxu1 %v3239_v0 }
 0x316   :  { %766 = vmatpush1.msra.mxu0 %v2117_v10  ;;  %1774 = vmatpush3.msra.mxu1 %v2202_v24 }
 0x317   :  { %767 = vmatprep.subr.mxu0 %v2123_v11  ;;  %1775 = vmatprep.subr.mxu1 %v3239_v0 }
 0x318   :  { %768 = vmatpush1.msra.mxu0 %v2129_v12  ;;  %1776 = vmatpush3.msra.mxu1 %v2221_v27  ;;  %v1460_v12 = vld [vmem:[%s3223_s0 + $0x50] sm:$0xff] }
 0x319   :  { %769 = vmatprep.subr.mxu0 %v2135_v13  ;;  %1777 = vmatprep.subr.mxu1 %v3239_v0 }
 0x31a   :  { %770 = vmatpush1.msra.mxu0 %v2146_v15  ;;  %1778 = vmatpush3.msra.mxu1 %v2240_v30 }
 0x31b   :  { %771 = vmatprep.subr.mxu0 %v2158_v17  ;;  %1779 = vmatprep.subr.mxu1 %v3239_v0 }
 0x31c   :  { %772 = vmatpush1.msra.mxu0 %v2170_v19  ;;  %1780 = vmatpush3.msra.mxu1 %v2259_v33 }
 0x31d   :  { %773 = vmatprep.subr.mxu0 %v2177_v20  ;;  %1781 = vmatprep.subr.mxu1 %v3239_v0 }
 0x31e   :  { %774 = vmatpush1.msra.mxu0 %v2189_v22  ;;  %1782 = vmatpush3.msra.mxu1 %v2278_v36 }
 0x31f   :  { %775 = vmatprep.subr.mxu0 %v2196_v23  ;;  %1783 = vmatprep.subr.mxu1 %v3239_v0 }
 0x320   :  { %776 = vmatpush1.msra.mxu0 %v2208_v25  ;;  %1784 = vmatpush3.msra.mxu1 %v2297_v39 }
 0x321   :  { %777 = vmatprep.subr.mxu0 %v2215_v26  ;;  %1785 = vmatprep.subr.mxu1 %v3239_v0 }
 0x322   :  { %778 = vmatpush1.msra.mxu0 %v2227_v28  ;;  %1786 = vmatpush3.msra.mxu1 %v2316_v42 }
 0x323   :  { %779 = vmatprep.subr.mxu0 %v2234_v29  ;;  %1787 = vmatprep.subr.mxu1 %v3239_v0 }
 0x324   :  { %780 = vmatpush1.msra.mxu0 %v2246_v31  ;;  %1788 = vmatpush3.msra.mxu1 %v2330_v44 }
 0x325   :  { %781 = vmatprep.subr.mxu0 %v2253_v32  ;;  %1789 = vmatprep.subr.mxu1 %v3239_v0 }
 0x326   :  { %782 = vmatpush1.msra.mxu0 %v2265_v34  ;;  %1790 = vmatpush3.msra.mxu1 %v2339_v45 }
 0x327   :  { %783 = vmatprep.subr.mxu0 %v2272_v35  ;;  %1791 = vmatprep.subr.mxu1 %v3239_v0 }
 0x328   :  { %784 = vmatpush1.msra.mxu0 %v2284_v37  ;;  %1792 = vmatpush3.msra.mxu1 %v2347_v46 }
 0x329   :  { %785 = vmatprep.subr.mxu0 %v2291_v38  ;;  %1793 = vmatprep.subr.mxu1 %v3239_v0 }
 0x32a   :  { %786 = vmatpush1.msra.mxu0 %v2303_v40  ;;  %1794 = vmatpush3.msra.mxu1 %v2356_v47 }
 0x32b   :  { %787 = vmatprep.subr.mxu0 %v2310_v41  ;;  %1795 = vmatprep.subr.mxu1 %v3239_v0 }
 0x32c   :  { %788 = vmatpush1.msra.mxu0 %v3242_v1  ;;  %821 = vmatprep.mubr.f32.mxu0 %v3239_v0 }
 0x32d   :  { %1796 = vmatpush3.msra.mxu1 %v3243_v2  ;;  %1797 = vmatprep.mubr.msk.f32.mxu1 %vm2037_vm0, %v3239_v0 }
 0x32e   :  { %928 = vmatprep.subr.mxu0 %v3244_v4  ;;  %1800 = vmatprep.subr.mxu1 %v3239_v0  ;;  %v2748_v4 = vld [vmem:[%s3222_s1 + $0x138] sm:$0xff] }
 0x3cd   :  { %v652_v6 = vpop.f32.mrf.mxu0  ;;  %v723_v7 = vpop.f32.mrf.mxu1 }
 0x3ce   :  { %v731_v8 = vadd.f32 %v1459_v5, %v652_v6  ;;  %v745_v48 = vadd.f32 %v2445_v62, %v723_v7  ;;  %v2762_v5 = vld [vmem:[%s3222_s1 + $0x120] sm:$0xff]  ;;  %v2776_v6 = vld [vmem:[%s3222_s1 + $0x108] sm:$0xff]  ;;  %v2790_v7 = vld [vmem:[%s3222_s1 + $0xf0] sm:$0xff] }
 0x3cf   :  { %v1764_v9 = vpop.f32.mrf.mxu1  ;;  %v654_v11 = vpop.f32.mrf.mxu0 }
 0x3d0   :  { %v1462_v10 = vmul.f32 -1.442695, %v731_v8  ;;  %v738_v13 = vadd.f32 %v1460_v12, %v654_v11  ;;  %v2804_v8 = vld [vmem:[%s3222_s1 + $0xd8] sm:$0xff]  ;;  %v2891_v9 = vld [vmem:[%s3222_s1 + $0x160] sm:$0xff]  ;;  %v2909_v11 = vld [vmem:[%s3222_s1 + $0x130] sm:$0xff] }
 0x3d1   :  { %v2918_v12 = vld [vmem:[%s3222_s1 + $0x118] sm:$0xff] }
 0x3d2   :  { %1937 = vpow2.f32 %v1462_v10  ;;  %v1463_v15 = vmul.f32 -1.442695, %v738_v13  ;;  %v2900_v10 = vld [vmem:[%s3222_s1 + $0x148] sm:$0xff]  ;;  %v2927_v13 = vld [vmem:[%s3222_s1 + $0x100] sm:$0xff] }
 0x3d4   :  { %1939 = vpow2.f32 %v1463_v15  ;;  %v2936_v15 = vld [vmem:[%s3222_s1 + $0xe8] sm:$0xff] }
 0x3df   :  { %v1938_v17 = vpop.eup %1937 }
 0x3e0   :  { %v735_v43 = vadd.f32 1.0, %v1938_v17  ;;  %v2944_v17 = vld [vmem:[%s3222_s1 + $0xc0] sm:$0xff] }
 0x3e1   :  { %v1940_v55 = vpop.eup %1939 }
 0x3e2   :  { %1941 = vrcp.f32 %v735_v43  ;;  %v742_v3 = vadd.f32 1.0, %v1940_v55  ;;  %v2950_v43 = vld [vmem:[%s3222_s1 + $0xd0] sm:$0xff] }
 0x3e3   :  { %v2956_v55 = vld [vmem:[%s3222_s1 + $0xb0] sm:$0xff] }
 0x3e4   :  { %1943 = vrcp.f32 %v742_v3  ;;  %v2963_v3 = vld [vmem:[%s3222_s1 + $0xa8] sm:$0xff] }
 0x3ef   :  { %v1942_v57 = vpop.eup %1941 }
 0x3f0   :  { %v746_v53 = vmul.f32 %v1942_v57, %v745_v48  ;;  %v2969_v48 = vld [vmem:[%s3222_s1 + $0xb8] sm:$0xff] }
 0x3f1   :  { %v1944_v60 = vpop.eup %1943  ;;  %v2975_v57 = vld [vmem:[%s3222_s1 + $0x98] sm:$0xff] }
 0x3f2   :  { %v747_v54 = vadd.f32 %v1461_v52, %v746_v53  ;;  %v749_v63 = vsub.f32 1.0, %v1944_v60  ;;  %v751_v56 = vmul.f32 %v1944_v60, %v2623_v51  ;;  %v2734_v51 = vld [vmem:[%s3222_s1 + $0x150] sm:$0xff]  ;;  %v2988_v53 = vld [vmem:[%s3222_s1 + $0xa0] sm:$0xff]  ;;  %v3001_v60 = vld [vmem:[%s3222_s1 + $0x78] sm:$0xff] }
 0x3f3   :  { %v2982_v52 = vld [vmem:[%s3222_s1 + $0x90] sm:$0xff] }
 0x3f4   :  { %1945 = vtanh.f32 %v747_v54  ;;  %v2994_v54 = vld [vmem:[%s3222_s1 + $0x80] sm:$0xff] }
 0x401   :  { %v1946_v58 = vpop.eup %1945 }
 0x402   :  { %v750_v59 = vmul.f32 %v1946_v58, %v749_v63  ;;  %v3007_v63 = vld [vmem:[%s3222_s1 + $0x88] sm:$0xff] }
 0x403   :  { %v3013_v58 = vld [vmem:[%s3222_s1 + $0x68] sm:$0xff] }
 0x404   :  { %v2709_v61 = vadd.f32 %v751_v56, %v750_v59  ;;  %v3020_v59 = vld [vmem:[%s3222_s1 + $0x60] sm:$0xff]  ;;  %v3026_v56 = vld [vmem:[%s3222_s1 + $0x70] sm:$0xff] }
 0x406   :  { %1464 = vst [vmem:[%s3225_s3 + $0x18] sm:$0xff] %v2709_v61  ;;  %822 = vmatmul.mubr.f32.vlgmr.msra.gmra.mxu0 %v2709_v61  ;;  %1798 = vmatmul.mubr.f32.vlgmr.msra.gmra.mxu1 %v2709_v61 }
 0x407   :  { %929 = vmatpush1.msra.mxu0 %v2720_v49  ;;  %1801 = vmatpush3.msra.mxu1 %v2140_v14  ;;  %v2741_v14 = vld [vmem:[%s3222_s1 + $0x140] sm:$0xff] }
 0x408   :  { %930 = vmatprep.subr.mxu0 %v2727_v50  ;;  %1802 = vmatprep.subr.mxu1 %v3239_v0 }
 0x409   :  { %931 = vmatpush1.msra.mxu0 %v2734_v51  ;;  %1803 = vmatpush3.msra.mxu1 %v2152_v16  ;;  %v2755_v16 = vld [vmem:[%s3222_s1 + $0x128] sm:$0xff] }
 0x40a   :  { %932 = vmatprep.subr.mxu0 %v2741_v14  ;;  %1804 = vmatprep.subr.mxu1 %v3239_v0 }
 0x40b   :  { %933 = vmatpush1.msra.mxu0 %v2748_v4  ;;  %1805 = vmatpush3.msra.mxu1 %v2164_v18  ;;  %v2769_v18 = vld [vmem:[%s3222_s1 + $0x110] sm:$0xff] }
 0x40c   :  { %934 = vmatprep.subr.mxu0 %v2755_v16  ;;  %1806 = vmatprep.subr.mxu1 %v3239_v0 }
 0x40d   :  { %935 = vmatpush1.msra.mxu0 %v2762_v5  ;;  %1807 = vmatpush3.msra.mxu1 %v2183_v21  ;;  %v2783_v21 = vld [vmem:[%s3222_s1 + $0xf8] sm:$0xff] }
 0x40e   :  { %936 = vmatprep.subr.mxu0 %v2769_v18  ;;  %1808 = vmatprep.subr.mxu1 %v3239_v0 }
 0x40f   :  { %937 = vmatpush1.msra.mxu0 %v2776_v6  ;;  %1809 = vmatpush3.msra.mxu1 %v2202_v24  ;;  %v2797_v24 = vld [vmem:[%s3222_s1 + $0xe0] sm:$0xff] }
 0x410   :  { %938 = vmatprep.subr.mxu0 %v2783_v21  ;;  %1810 = vmatprep.subr.mxu1 %v3239_v0 }
 0x411   :  { %939 = vmatpush1.msra.mxu0 %v2790_v7  ;;  %1811 = vmatpush3.msra.mxu1 %v2221_v27  ;;  %v2811_v27 = vld [vmem:[%s3222_s1 + $0xc8] sm:$0xff] }
 0x412   :  { %940 = vmatprep.subr.mxu0 %v2797_v24  ;;  %1812 = vmatprep.subr.mxu1 %v3239_v0 }
 0x413   :  { %941 = vmatpush1.msra.mxu0 %v2804_v8  ;;  %1813 = vmatpush3.msra.mxu1 %v2240_v30  ;;  %v1466_v30 = vld [vmem:[%s3223_s0 + $0x68] sm:$0xff] }
 0x414   :  { %942 = vmatprep.subr.mxu0 %v2811_v27  ;;  %1814 = vmatprep.subr.mxu1 %v3239_v0 }
 0x415   :  { %943 = vmatpush1.msra.mxu0 %v2170_v19  ;;  %1815 = vmatpush3.msra.mxu1 %v2259_v33  ;;  %v2855_v19 = vld [vmem:[%s3222_s1 + $0x170] sm:$0xff] }
 0x416   :  { %944 = vmatprep.subr.mxu0 %v2177_v20  ;;  %1816 = vmatprep.subr.mxu1 %v3239_v0  ;;  %v1465_v20 = vld [vmem:[%s3223_s0 + $0x60] sm:$0xff] }
 0x417   :  { %945 = vmatpush1.msra.mxu0 %v2189_v22  ;;  %1817 = vmatpush3.msra.mxu1 %v2278_v36 }
 0x418   :  { %946 = vmatprep.subr.mxu0 %v2196_v23  ;;  %1818 = vmatprep.subr.mxu1 %v3239_v0 }
 0x419   :  { %947 = vmatpush1.msra.mxu0 %v2208_v25  ;;  %1819 = vmatpush3.msra.mxu1 %v2297_v39  ;;  %v1467_v39 = vld [vmem:[%s3223_s0 + $0x70] sm:$0xff] }
 0x41a   :  { %948 = vmatprep.subr.mxu0 %v2215_v26  ;;  %1820 = vmatprep.subr.mxu1 %v3239_v0 }
 0x41b   :  { %949 = vmatpush1.msra.mxu0 %v2227_v28  ;;  %1821 = vmatpush3.msra.mxu1 %v2316_v42 }
 0x41c   :  { %950 = vmatprep.subr.mxu0 %v2234_v29  ;;  %1822 = vmatprep.subr.mxu1 %v3239_v0 }
 0x41d   :  { %951 = vmatpush1.msra.mxu0 %v2246_v31  ;;  %1823 = vmatpush3.msra.mxu1 %v2330_v44 }
 0x41e   :  { %952 = vmatprep.subr.mxu0 %v2253_v32  ;;  %1824 = vmatprep.subr.mxu1 %v3239_v0 }
 0x41f   :  { %953 = vmatpush1.msra.mxu0 %v2265_v34  ;;  %1825 = vmatpush3.msra.mxu1 %v2339_v45 }
 0x420   :  { %954 = vmatprep.subr.mxu0 %v2272_v35  ;;  %1826 = vmatprep.subr.mxu1 %v3239_v0 }
 0x421   :  { %955 = vmatpush1.msra.mxu0 %v2284_v37  ;;  %1827 = vmatpush3.msra.mxu1 %v2347_v46 }
 0x422   :  { %956 = vmatprep.subr.mxu0 %v2291_v38  ;;  %1828 = vmatprep.subr.mxu1 %v3239_v0 }
 0x423   :  { %957 = vmatpush1.msra.mxu0 %v2303_v40  ;;  %1829 = vmatpush3.msra.mxu1 %v2356_v47 }
 0x424   :  { %958 = vmatprep.subr.mxu0 %v2310_v41  ;;  %1830 = vmatprep.subr.mxu1 %v3239_v0 }
 0x425   :  { %959 = vmatpush1.msra.mxu0 %v3242_v1  ;;  %992 = vmatprep.mubr.f32.mxu0 %v3239_v0 }
 0x426   :  { %1831 = vmatpush3.msra.mxu1 %v3243_v2  ;;  %1832 = vmatprep.mubr.msk.f32.mxu1 %vm2037_vm0, %v3239_v0  ;;  %v2882_v2 = vld [vmem:[%s3222_s1 + $0x178] sm:$0xff] }
 0x427   :  { %1099 = vmatprep.subr.mxu0 %v2855_v19  ;;  %1835 = vmatprep.subr.mxu1 %v3239_v0 }
 0x4c6   :  { %v823_v22 = vpop.f32.mrf.mxu0  ;;  %v894_v23 = vpop.f32.mrf.mxu1 }
 0x4c7   :  { %v902_v25 = vadd.f32 %v1465_v20, %v823_v22  ;;  %v916_v37 = vadd.f32 %v2445_v62, %v894_v23  ;;  %v3039_v20 = vld [vmem:[%s3222_s1 + $0x48] sm:$0xff]  ;;  %v3045_v22 = vld [vmem:[%s3222_s1 + $0x58] sm:$0xff] }
 0x4c8   :  { %v1799_v26 = vpop.f32.mrf.mxu1  ;;  %v825_v29 = vpop.f32.mrf.mxu0  ;;  %v3051_v23 = vld [vmem:[%s3222_s1 + $0x38] sm:$0xff] }
 0x4c9   :  { %v1468_v28 = vmul.f32 -1.442695, %v902_v25  ;;  %v909_v31 = vadd.f32 %v1466_v30, %v825_v29  ;;  %v3058_v25 = vld [vmem:[%s3222_s1 + $0x30] sm:$0xff]  ;;  %v3064_v26 = vld [vmem:[%s3222_s1 + $0x40] sm:$0xff]  ;;  %v3077_v29 = vld [vmem:[%s3222_s1 + $0x18] sm:$0xff] }
 0x4ca   :  { %v3083_v30 = vld [vmem:[%s3222_s1 + $0x28] sm:$0xff] }
 0x4cb   :  { %1947 = vpow2.f32 %v1468_v28  ;;  %v1469_v32 = vmul.f32 -1.442695, %v909_v31  ;;  %v3070_v28 = vld [vmem:[%s3222_s1 + $0x20] sm:$0xff]  ;;  %v3089_v31 = vld [vmem:[%s3222_s1 + $0x8] sm:$0xff] }
 0x4cd   :  { %1949 = vpow2.f32 %v1469_v32  ;;  %v3096_v32 = vld [vmem:[%s3222_s1] sm:$0xff] }
 0x4ce   :  { %3245 = vst [vmem:[#allocation4_spill] sm:$0xff] %v3096_v32 }
 0x4d8   :  { %v1948_v33 = vpop.eup %1947 }
 0x4d9   :  { %v906_v34 = vadd.f32 1.0, %v1948_v33  ;;  %v3103_v33 = vld [vmem:[%s3222_s1 + $0x10] sm:$0xff] }
 0x4da   :  { %v1950_v35 = vpop.eup %1949  ;;  %3246 = vst [vmem:[#allocation5_spill] sm:$0xff] %v3103_v33 }
 0x4db   :  { %1951 = vrcp.f32 %v906_v34  ;;  %v913_v36 = vadd.f32 1.0, %v1950_v35  ;;  %v1471_v34 = vld [vmem:[%s3223_s0 + $0x78] sm:$0xff] }
 0x4dd   :  { %1953 = vrcp.f32 %v913_v36 }
 0x4e8   :  { %v1952_v38 = vpop.eup %1951 }
 0x4e9   :  { %v917_v40 = vmul.f32 %v1952_v38, %v916_v37 }
 0x4ea   :  { %v1954_v42 = vpop.eup %1953 }
 0x4eb   :  { %v918_v41 = vadd.f32 %v1467_v39, %v917_v40  ;;  %v920_v44 = vsub.f32 1.0, %v1954_v42  ;;  %v922_v47 = vmul.f32 %v1954_v42, %v2709_v61  ;;  %v3032_v61 = vld [vmem:[%s3222_s1 + $0x50] sm:$0xff] }
 0x4ed   :  { %1955 = vtanh.f32 %v918_v41  ;;  %v1472_v41 = vld [vmem:[%s3223_s0 + $0x80] sm:$0xff] }
 0x4fa   :  { %v1956_v45 = vpop.eup %1955 }
 0x4fb   :  { %v921_v46 = vmul.f32 %v1956_v45, %v920_v44 }
 0x4fd   :  { %v2870_v1 = vadd.f32 %v922_v47, %v921_v46 }
 0x4ff   :  { %1470 = vst [vmem:[%s3225_s3 + $0x20] sm:$0xff] %v2870_v1  ;;  %993 = vmatmul.mubr.f32.vlgmr.msra.gmra.mxu0 %v2870_v1  ;;  %1833 = vmatmul.mubr.f32.vlgmr.msra.gmra.mxu1 %v2870_v1 }
 0x500   :  { %1100 = vmatpush1.msra.mxu0 %v2720_v49  ;;  %1836 = vmatpush3.msra.mxu1 %v2882_v2 }
 0x501   :  { %1101 = vmatprep.subr.mxu0 %v2727_v50  ;;  %1837 = vmatprep.subr.mxu1 %v3239_v0 }
 0x502   :  { %1102 = vmatpush1.msra.mxu0 %v2734_v51  ;;  %1838 = vmatpush3.msra.mxu1 %v2891_v9 }
 0x503   :  { %1103 = vmatprep.subr.mxu0 %v2741_v14  ;;  %1839 = vmatprep.subr.mxu1 %v3239_v0 }
 0x504   :  { %1104 = vmatpush1.msra.mxu0 %v2748_v4  ;;  %1840 = vmatpush3.msra.mxu1 %v2900_v10 }
 0x505   :  { %1105 = vmatprep.subr.mxu0 %v2755_v16  ;;  %1841 = vmatprep.subr.mxu1 %v3239_v0 }
 0x506   :  { %1106 = vmatpush1.msra.mxu0 %v2762_v5  ;;  %1842 = vmatpush3.msra.mxu1 %v2909_v11 }
 0x507   :  { %1107 = vmatprep.subr.mxu0 %v2769_v18  ;;  %1843 = vmatprep.subr.mxu1 %v3239_v0 }
 0x508   :  { %1108 = vmatpush1.msra.mxu0 %v2776_v6  ;;  %1844 = vmatpush3.msra.mxu1 %v2918_v12 }
 0x509   :  { %1109 = vmatprep.subr.mxu0 %v2783_v21  ;;  %1845 = vmatprep.subr.mxu1 %v3239_v0 }
 0x50a   :  { %1110 = vmatpush1.msra.mxu0 %v2790_v7  ;;  %1846 = vmatpush3.msra.mxu1 %v2927_v13 }
 0x50b   :  { %1111 = vmatprep.subr.mxu0 %v2797_v24  ;;  %1847 = vmatprep.subr.mxu1 %v3239_v0 }
 0x50c   :  { %1112 = vmatpush1.msra.mxu0 %v2804_v8  ;;  %1848 = vmatpush3.msra.mxu1 %v2936_v15 }
 0x50d   :  { %1113 = vmatprep.subr.mxu0 %v2811_v27  ;;  %1849 = vmatprep.subr.mxu1 %v3239_v0 }
 0x50e   :  { %1114 = vmatpush1.msra.mxu0 %v2944_v17  ;;  %1850 = vmatpush3.msra.mxu1 %v2950_v43 }
 0x50f   :  { %1115 = vmatprep.subr.mxu0 %v2956_v55  ;;  %1851 = vmatprep.subr.mxu1 %v3239_v0 }
 0x510   :  { %1116 = vmatpush1.msra.mxu0 %v2963_v3  ;;  %1852 = vmatpush3.msra.mxu1 %v2969_v48 }
 0x511   :  { %1117 = vmatprep.subr.mxu0 %v2975_v57  ;;  %1853 = vmatprep.subr.mxu1 %v3239_v0 }
 0x512   :  { %1118 = vmatpush1.msra.mxu0 %v2982_v52  ;;  %1854 = vmatpush3.msra.mxu1 %v2988_v53 }
 0x513   :  { %1119 = vmatprep.subr.mxu0 %v2994_v54  ;;  %1855 = vmatprep.subr.mxu1 %v3239_v0 }
 0x514   :  { %1120 = vmatpush1.msra.mxu0 %v3001_v60  ;;  %1856 = vmatpush3.msra.mxu1 %v3007_v63 }
 0x515   :  { %1121 = vmatprep.subr.mxu0 %v3013_v58  ;;  %1857 = vmatprep.subr.mxu1 %v3239_v0 }
 0x516   :  { %1122 = vmatpush1.msra.mxu0 %v3020_v59  ;;  %1858 = vmatpush3.msra.mxu1 %v3026_v56 }
 0x517   :  { %1123 = vmatprep.subr.mxu0 %v3032_v61  ;;  %1859 = vmatprep.subr.mxu1 %v3239_v0 }
 0x518   :  { %1124 = vmatpush1.msra.mxu0 %v3039_v20  ;;  %1860 = vmatpush3.msra.mxu1 %v3045_v22 }
 0x519   :  { %1125 = vmatprep.subr.mxu0 %v3051_v23  ;;  %1861 = vmatprep.subr.mxu1 %v3239_v0 }
 0x51a   :  { %1126 = vmatpush1.msra.mxu0 %v3058_v25  ;;  %1862 = vmatpush3.msra.mxu1 %v3064_v26 }
 0x51b   :  { %1127 = vmatprep.subr.mxu0 %v3070_v28  ;;  %1863 = vmatprep.subr.mxu1 %v3239_v0 }
 0x51c   :  { %1128 = vmatpush1.msra.mxu0 %v3077_v29  ;;  %1864 = vmatpush3.msra.mxu1 %v3083_v30 }
 0x51d   :  { %1129 = vmatprep.subr.mxu0 %v3089_v31  ;;  %1865 = vmatprep.subr.mxu1 %v3239_v0 }
 0x51e   :  { %1130 = vmatpush1.msra.mxu0 %v3096_v32  ;;  %1163 = vmatprep.mubr.f32.mxu0 %v3239_v0 }
 0x51f   :  { %1866 = vmatpush3.msra.mxu1 %v3103_v33  ;;  %1867 = vmatprep.mubr.msk.f32.mxu1 %vm2037_vm0, %v3239_v0 }
 0x520   :  { %1270 = vmatprep.subr.mxu0 %v2855_v19  ;;  %1870 = vmatprep.subr.mxu1 %v3239_v0 }
 0x5bf   :  { %v994_v35 = vpop.f32.mrf.mxu0  ;;  %v1065_v36 = vpop.f32.mrf.mxu1 }
 0x5c0   :  { %v1073_v37 = vadd.f32 %v1471_v34, %v994_v35  ;;  %v1087_v33 = vadd.f32 %v2445_v62, %v1065_v36  ;;  %v1473_v34 = vld [vmem:[%s3223_s0 + $0x88] sm:$0xff] }
 0x5c1   :  { %v1834_v38 = vpop.f32.mrf.mxu1  ;;  %v996_v40 = vpop.f32.mrf.mxu0  ;;  %v3247_v62 = vld [vmem:[#allocation4_spill] sm:$0xff] }
 0x5c2   :  { %v1474_v39 = vmul.f32 -1.442695, %v1073_v37  ;;  %v1080_v42 = vadd.f32 %v1472_v41, %v996_v40 }
 0x5c4   :  { %1957 = vpow2.f32 %v1474_v39  ;;  %v1475_v44 = vmul.f32 -1.442695, %v1080_v42 }
 0x5c6   :  { %1959 = vpow2.f32 %v1475_v44 }
 0x5d1   :  { %v1958_v19 = vpop.eup %1957 }
 0x5d2   :  { %v1077_v45 = vadd.f32 1.0, %v1958_v19 }
 0x5d3   :  { %v1960_v46 = vpop.eup %1959 }
 0x5d4   :  { %1961 = vrcp.f32 %v1077_v45  ;;  %v1084_v47 = vadd.f32 1.0, %v1960_v46 }
 0x5d6   :  { %1963 = vrcp.f32 %v1084_v47 }
 0x5e1   :  { %v1962_v32 = vpop.eup %1961 }
 0x5e2   :  { %v1088_v35 = vmul.f32 %v1962_v32, %v1087_v33 }
 0x5e3   :  { %v1964_v38 = vpop.eup %1963 }
 0x5e4   :  { %v1089_v37 = vadd.f32 %v1473_v34, %v1088_v35  ;;  %v1091_v39 = vsub.f32 1.0, %v1964_v38  ;;  %v1093_v42 = vmul.f32 %v1964_v38, %v2870_v1  ;;  %v2035_v1 = vld [vmem:[%s3224_s2] ss:$0 sm:$0xff] }
 0x5e6   :  { %1965 = vtanh.f32 %v1089_v37 }
 0x5f3   :  { %v1966_v40 = vpop.eup %1965 }
 0x5f4   :  { %v1092_v41 = vmul.f32 %v1966_v40, %v1091_v39 }
 0x5f6   :  { %v3121_v44 = vadd.f32 %v1093_v42, %v1092_v41 }
 0x5f8   :  { %1476 = vst [vmem:[%s3225_s3 + $0x28] sm:$0xff] %v3121_v44  ;;  %1164 = vmatmul.mubr.f32.vlgmr.msra.gmra.mxu0 %v3121_v44  ;;  %1868 = vmatmul.mubr.f32.vlgmr.msra.gmra.mxu1 %v3121_v44 }
 0x5f9   :  { %1271 = vmatpush1.msra.mxu0 %v2720_v49  ;;  %1871 = vmatpush3.msra.mxu1 %v2882_v2  ;;  %v3248_v49 = vld [vmem:[#allocation5_spill] sm:$0xff] }
 0x5fa   :  { %1272 = vmatprep.subr.mxu0 %v2727_v50  ;;  %1872 = vmatprep.subr.mxu1 %v3239_v0  ;;  %v1477_v50 = vld [vmem:[%s3223_s0 + $0x90] sm:$0xff] }
 0x5fb   :  { %1273 = vmatpush1.msra.mxu0 %v2734_v51  ;;  %1873 = vmatpush3.msra.mxu1 %v2891_v9 }
 0x5fc   :  { %1274 = vmatprep.subr.mxu0 %v2741_v14  ;;  %1874 = vmatprep.subr.mxu1 %v3239_v0 }
 0x5fd   :  { %1275 = vmatpush1.msra.mxu0 %v2748_v4  ;;  %1875 = vmatpush3.msra.mxu1 %v2900_v10  ;;  %v1479_v10 = vld [vmem:[%s3223_s0 + $0xa0] sm:$0xff] }
 0x5fe   :  { %1276 = vmatprep.subr.mxu0 %v2755_v16  ;;  %1876 = vmatprep.subr.mxu1 %v3239_v0 }
 0x5ff   :  { %1277 = vmatpush1.msra.mxu0 %v2762_v5  ;;  %1877 = vmatpush3.msra.mxu1 %v2909_v11 }
 0x600   :  { %1278 = vmatprep.subr.mxu0 %v2769_v18  ;;  %1878 = vmatprep.subr.mxu1 %v3239_v0 }
 0x601   :  { %1279 = vmatpush1.msra.mxu0 %v2776_v6  ;;  %1879 = vmatpush3.msra.mxu1 %v2918_v12  ;;  %v1478_v6 = vld [vmem:[%s3223_s0 + $0x98] sm:$0xff] }
 0x602   :  { %1280 = vmatprep.subr.mxu0 %v2783_v21  ;;  %1880 = vmatprep.subr.mxu1 %v3239_v0 }
 0x603   :  { %1281 = vmatpush1.msra.mxu0 %v2790_v7  ;;  %1881 = vmatpush3.msra.mxu1 %v2927_v13 }
 0x604   :  { %1282 = vmatprep.subr.mxu0 %v2797_v24  ;;  %1882 = vmatprep.subr.mxu1 %v3239_v0 }
 0x605   :  { %1283 = vmatpush1.msra.mxu0 %v2804_v8  ;;  %1883 = vmatpush3.msra.mxu1 %v2936_v15 }
 0x606   :  { %1284 = vmatprep.subr.mxu0 %v2811_v27  ;;  %1884 = vmatprep.subr.mxu1 %v3239_v0 }
 0x607   :  { %1285 = vmatpush1.msra.mxu0 %v2944_v17  ;;  %1885 = vmatpush3.msra.mxu1 %v2950_v43 }
 0x608   :  { %1286 = vmatprep.subr.mxu0 %v2956_v55  ;;  %1886 = vmatprep.subr.mxu1 %v3239_v0 }
 0x609   :  { %1287 = vmatpush1.msra.mxu0 %v2963_v3  ;;  %1887 = vmatpush3.msra.mxu1 %v2969_v48  ;;  %v1483_v48 = vld [vmem:[%s3223_s0 + $0xa8] sm:$0xff] }
 0x60a   :  { %1288 = vmatprep.subr.mxu0 %v2975_v57  ;;  %1888 = vmatprep.subr.mxu1 %v3239_v0 }
 0x60b   :  { %1289 = vmatpush1.msra.mxu0 %v2982_v52  ;;  %1889 = vmatpush3.msra.mxu1 %v2988_v53 }
 0x60c   :  { %1290 = vmatprep.subr.mxu0 %v2994_v54  ;;  %1890 = vmatprep.subr.mxu1 %v3239_v0 }
 0x60d   :  { %1291 = vmatpush1.msra.mxu0 %v3001_v60  ;;  %1891 = vmatpush3.msra.mxu1 %v3007_v63 }
 0x60e   :  { %1292 = vmatprep.subr.mxu0 %v3013_v58  ;;  %1892 = vmatprep.subr.mxu1 %v3239_v0  ;;  %v1484_v58 = vld [vmem:[%s3223_s0 + $0xb0] sm:$0xff] }
 0x60f   :  { %1293 = vmatpush1.msra.mxu0 %v3020_v59  ;;  %1893 = vmatpush3.msra.mxu1 %v3026_v56 }
 0x610   :  { %1294 = vmatprep.subr.mxu0 %v3032_v61  ;;  %1894 = vmatprep.subr.mxu1 %v3239_v0 }
 0x611   :  { %1295 = vmatpush1.msra.mxu0 %v3039_v20  ;;  %1895 = vmatpush3.msra.mxu1 %v3045_v22 }
 0x612   :  { %1296 = vmatprep.subr.mxu0 %v3051_v23  ;;  %1896 = vmatprep.subr.mxu1 %v3239_v0 }
 0x613   :  { %1297 = vmatpush1.msra.mxu0 %v3058_v25  ;;  %1897 = vmatpush3.msra.mxu1 %v3064_v26 }
 0x614   :  { %1298 = vmatprep.subr.mxu0 %v3070_v28  ;;  %1898 = vmatprep.subr.mxu1 %v3239_v0  ;;  %v1485_v28 = vld [vmem:[%s3223_s0 + $0xb8] sm:$0xff] }
 0x615   :  { %1299 = vmatpush1.msra.mxu0 %v3077_v29  ;;  %1899 = vmatpush3.msra.mxu1 %v3083_v30 }
 0x616   :  { %1300 = vmatprep.subr.mxu0 %v3089_v31  ;;  %1900 = vmatprep.subr.mxu1 %v3239_v0 }
 0x617   :  { %1301 = vmatpush1.msra.mxu0 %v3247_v62  ;;  %1334 = vmatprep.mubr.f32.mxu0 %v3239_v0 }
 0x618   :  { %1901 = vmatpush3.msra.mxu1 %v3248_v49  ;;  %1902 = vmatprep.mubr.msk.f32.mxu1 %vm2037_vm0, %v3239_v0 }
 0x6b8   :  { %v1165_v51 = vpop.f32.mrf.mxu0  ;;  %v1236_v14 = vpop.f32.mrf.mxu1 }
 0x6b9   :  { %v1244_v4 = vadd.f32 %v1477_v50, %v1165_v51  ;;  %v1258_v2 = vadd.f32 %v2035_v1, %v1236_v14 }
 0x6ba   :  { %v1869_v16 = vpop.f32.mrf.mxu1  ;;  %v1167_v18 = vpop.f32.mrf.mxu0 }
 0x6bb   :  { %v1480_v5 = vmul.f32 -1.442695, %v1244_v4  ;;  %v1251_v21 = vadd.f32 %v1478_v6, %v1167_v18 }
 0x6bd   :  { %1967 = vpow2.f32 %v1480_v5  ;;  %v1481_v7 = vmul.f32 -1.442695, %v1251_v21 }
 0x6bf   :  { %1969 = vpow2.f32 %v1481_v7 }
 0x6ca   :  { %v1968_v24 = vpop.eup %1967 }
 0x6cb   :  { %v1248_v0 = vadd.f32 1.0, %v1968_v24 }
 0x6cc   :  { %v1970_v8 = vpop.eup %1969 }
 0x6cd   :  { %1971 = vrcp.f32 %v1248_v0  ;;  %v1255_v27 = vadd.f32 1.0, %v1970_v8 }
 0x6cf   :  { %1973 = vrcp.f32 %v1255_v27 }
 0x6da   :  { %v1972_v9 = vpop.eup %1971 }
 0x6db   :  { %v1259_v11 = vmul.f32 %v1972_v9, %v1258_v2 }
 0x6dc   :  { %v1974_v13 = vpop.eup %1973 }
 0x6dd   :  { %v1260_v12 = vadd.f32 %v1479_v10, %v1259_v11  ;;  %v1262_v15 = vsub.f32 1.0, %v1974_v13  ;;  %v1264_v55 = vmul.f32 %v1974_v13, %v3121_v44 }
 0x6df   :  { %1975 = vtanh.f32 %v1260_v12 }
 0x6ec   :  { %v1976_v17 = vpop.eup %1975 }
 0x6ed   :  { %v1263_v43 = vmul.f32 %v1976_v17, %v1262_v15 }
 0x6ef   :  { %v1265_v3 = vadd.f32 %v1264_v55, %v1263_v43 }
 0x6f1   :  { %1482 = vst [vmem:[%s3225_s3 + $0x30] sm:$0xff] %v1265_v3  ;;  %1335 = vmatmul.mubr.f32.vlgmr.msra.gmra.mxu0 %v1265_v3  ;;  %1903 = vmatmul.mubr.f32.vlgmr.msra.gmra.mxu1 %v1265_v3 }
 0x7b1   :  { %v1336_v57 = vpop.f32.mrf.mxu0  ;;  %v1407_v52 = vpop.f32.mrf.mxu1 }
 0x7b2   :  { %v1415_v53 = vadd.f32 %v1483_v48, %v1336_v57  ;;  %v1429_v25 = vadd.f32 %v2035_v1, %v1407_v52 }
 0x7b3   :  { %v1904_v54 = vpop.f32.mrf.mxu1  ;;  %v1338_v63 = vpop.f32.mrf.mxu0 }
 0x7b4   :  { %v1486_v60 = vmul.f32 -1.442695, %v1415_v53  ;;  %v1422_v59 = vadd.f32 %v1484_v58, %v1338_v63 }
 0x7b6   :  { %1977 = vpow2.f32 %v1486_v60  ;;  %v1487_v56 = vmul.f32 -1.442695, %v1422_v59 }
 0x7b8   :  { %1979 = vpow2.f32 %v1487_v56 }
 0x7c3   :  { %v1978_v61 = vpop.eup %1977 }
 0x7c4   :  { %v1419_v20 = vadd.f32 1.0, %v1978_v61 }
 0x7c5   :  { %v1980_v22 = vpop.eup %1979 }
 0x7c6   :  { %1981 = vrcp.f32 %v1419_v20  ;;  %v1426_v23 = vadd.f32 1.0, %v1980_v22 }
 0x7c8   :  { %1983 = vrcp.f32 %v1426_v23 }
 0x7d3   :  { %v1982_v26 = vpop.eup %1981 }
 0x7d4   :  { %v1430_v29 = vmul.f32 %v1982_v26, %v1429_v25 }
 0x7d5   :  { %v1984_v31 = vpop.eup %1983 }
 0x7d6   :  { %v1431_v30 = vadd.f32 %v1485_v28, %v1430_v29  ;;  %v1433_v32 = vsub.f32 1.0, %v1984_v31  ;;  %v1435_v19 = vmul.f32 %v1984_v31, %v1265_v3 }
 0x7d8   :  { %1985 = vtanh.f32 %v1431_v30 }
 0x7e5   :  { %v1986_v33 = vpop.eup %1985 }
 0x7e6   :  { %v1434_v36 = vmul.f32 %v1986_v33, %v1433_v32 }
 0x7e8   :  { %v1436_v45 = vadd.f32 %v1435_v19, %v1434_v36 }
 0x7ea   :  { %1488 = vst [vmem:[%s3225_s3 + $0x38] sm:$0xff] %v1436_v45 }

</bundles_post_ra>
